<compile_context>
chip_gen: v7x
topology: tpu7x:2x2x1
jax: 0.10.0
libtpu: 0.0.40
codegen_flags: <defaults>
</compile_context>

<pallas_src>
import functools

import jax
import jax.numpy as jnp
from jax.experimental import pallas as pl
from jax.experimental.pallas import tpu as pltpu

EMBEDDING_DIM = 128
FILTER_SIZES = (3, 4, 5)
N_FILTERS = 128
OUTPUT_DIM = 6
VOCAB_SIZE = 30522
PAD_IDX = 0
OUT_PAD = 128                       # lane-dense padded FC output width
N_TAPS = sum(FILTER_SIZES)          # 12
N_CAT = len(FILTER_SIZES) * N_FILTERS


def _round_up(x: int, m: int) -> int:
    return (x + m - 1) // m * m


def _textcnn_kernel(emb_ref, w_all_ref, b_all_ref, wfc_ref, bfc_ref, out_ref, *, seq_valid):
    """Fused conv1d(x3) + ReLU + global max-pool + linear for one batch tile.

    emb_ref  : (TB, L_pad, E)  activations (bf16 or f32); L_pad is a multiple of 8
    w_all_ref: (E, 12*F)       stacked conv taps: fs=3 (3 blocks of F), fs=4 (4), fs=5 (5)
    b_all_ref: (1, 3*F)  f32   conv biases packed [b3 | b4 | b5]
    wfc_ref  : (3F, OUT_PAD)   FC weight (zero-padded beyond OUTPUT_DIM)
    bfc_ref  : (1, OUT_PAD) f32
    out_ref  : (TB, OUT_PAD) f32
    seq_valid: original (unpadded) sequence length (static)
    """
    tb, l_pad, e = emb_ref.shape
    rows = tb * l_pad

    # One wide MXU matmul covering every tap of every filter width (bf16 in, f32 acc).
    emb2d = emb_ref[...].reshape(rows, e)                                 # (TB*L, E)
    u = jnp.dot(emb2d, w_all_ref[...], preferred_element_type=jnp.float32)  # (TB*L, 12F) f32

    # Time index, used to mask rolled-in / padded positions before the pool.
    t_idx = jax.lax.broadcasted_iota(jnp.int32, (l_pad, N_FILTERS), 0)    # (L_pad, F)

    # TODO(synk): for very long seq_len / huge TB, stream over 8-row time chunks with a
    # running per-tap max instead of materializing the full (TB*L, 12F) intermediate.
    def branch(fs, base, bias):
        # conv[b, l, f] = sum_k u[(b, l + k), base + k*F + f].  Lane slices are 128-aligned;
        # the time shift is a sublane rotation on the XLU (pltpu.roll), not an unaligned slice.
        acc = u[:, base:base + N_FILTERS]                                 # k = 0
        for k in range(1, fs):
            tap = u[:, base + k * N_FILTERS: base + (k + 1) * N_FILTERS]
            # roll by (rows - k)  <=>  shifted[r] = tap[(r + k) mod rows]; cross-batch /
            # wrapped rows only land in positions that are masked to -inf below.
            acc = acc + pltpu.roll(tap, shift=rows - k, axis=0)
        acc = acc.reshape(tb, l_pad, N_FILTERS)                           # layout no-op (L_pad % 8 == 0)
        acc = jnp.where(t_idx < (seq_valid - fs + 1), acc, -jnp.inf)
        pooled = jnp.max(acc, axis=1)                                     # (TB, F), pre-bias
        # Exact: max_l relu(x_l + b) == relu(max_l x_l + b)  (relu & +b are monotone).
        return jnp.maximum(pooled + bias, 0.0)

    act3 = branch(3, 0 * N_FILTERS, b_all_ref[:, 0 * N_FILTERS:1 * N_FILTERS])
    act4 = branch(4, 3 * N_FILTERS, b_all_ref[:, 1 * N_FILTERS:2 * N_FILTERS])
    act5 = branch(5, 7 * N_FILTERS, b_all_ref[:, 2 * N_FILTERS:3 * N_FILTERS])

    # Split-dot FC (replaces lane-axis concatenate); output is lane-dense (TB, 128).
    # TODO(synk): nn.Dropout is identity at inference; training-mode RNG masking not implemented.
    wdt = wfc_ref.dtype
    out = (jnp.dot(act3.astype(wdt), wfc_ref[0 * N_FILTERS:1 * N_FILTERS, :],
                   preferred_element_type=jnp.float32)
           + jnp.dot(act4.astype(wdt), wfc_ref[1 * N_FILTERS:2 * N_FILTERS, :],
                     preferred_element_type=jnp.float32)
           + jnp.dot(act5.astype(wdt), wfc_ref[2 * N_FILTERS:3 * N_FILTERS, :],
                     preferred_element_type=jnp.float32)
           + bfc_ref[...])
    out_ref[...] = out.astype(out_ref.dtype)


def textcnn_forward(text, params, *, compute_dtype=jnp.bfloat16, batch_tile=None):
    # Embedding gather stays in XLA (one fused HBM gather), cast to the MXU compute dtype
    # so the (B, L, E) HBM intermediate is half-width in the bf16 path.
    # TODO(synk): fuse the gather into the kernel (scalar-prefetch token ids + manual DMA
    # row gather from an HBM-resident table) to remove the HBM round trip entirely.
    embedded = jnp.take(params['embedding'], text, axis=0).astype(compute_dtype)  # (B, L, E)
    b, seq_len, e = embedded.shape
    assert seq_len >= max(FILTER_SIZES), "seq_len must be >= largest filter width"

    # Pad the time axis to a sublane multiple so in-kernel reshapes are layout no-ops;
    # padded positions are masked to -inf inside the kernel before the pool.
    l_pad = _round_up(seq_len, 8)
    if l_pad != seq_len:
        embedded = jnp.pad(embedded, ((0, 0), (0, l_pad - seq_len), (0, 0)))

    # Batch tile: as large as possible while keeping the (TB*L, 12F) f32 intermediate
    # around ~6 MiB (v7x VMEM is 64 MiB physical; v5e/v6e have far more headroom).
    if batch_tile is None:
        u_budget = 6 * 1024 * 1024
        tb = u_budget // (l_pad * N_TAPS * N_FILTERS * 4)
        tb = max(8, min(256, (tb // 8) * 8))
    else:
        tb = max(8, _round_up(batch_tile, 8))
    tb = min(tb, _round_up(b, 8))
    b_pad = _round_up(b, tb)
    # Keep >=2 grid steps when possible so ("parallel",) can split across v7x's 2 TCs.
    if b_pad // tb < 2 and tb % 16 == 0:
        tb //= 2
    if b_pad != b:
        embedded = jnp.pad(embedded, ((0, b_pad - b), (0, 0), (0, 0)))

    # Stack all conv taps along the output axis: (E, (3+4+5)*F).
    w_all = jnp.concatenate(
        [jnp.transpose(params[f'conv{fs}_w'], (1, 0, 2)).reshape(e, fs * N_FILTERS)
         for fs in FILTER_SIZES],
        axis=-1,
    ).astype(compute_dtype)

    # Pack conv biases into a single (1, 3F) input; keep biases in f32.
    b_all = jnp.concatenate(
        [params[f'conv{fs}_b'] for fs in FILTER_SIZES], axis=-1
    ).astype(jnp.float32)

    # Lane-pad the FC weight/bias to 128 output columns so kernel stores are lane-dense.
    wfc = jnp.zeros((N_CAT, OUT_PAD), compute_dtype)
    wfc = wfc.at[:, :OUTPUT_DIM].set(params['fc_w'].astype(compute_dtype))
    bfc = jnp.zeros((1, OUT_PAD), jnp.float32).at[:, :OUTPUT_DIM].set(params['fc_b'])

    itemsize = jnp.dtype(compute_dtype).itemsize
    flops = 2 * b_pad * l_pad * e * (N_TAPS * N_FILTERS) + 2 * b_pad * N_CAT * OUT_PAD
    bytes_accessed = (b_pad * l_pad * e * itemsize           # activations in
                      + e * N_TAPS * N_FILTERS * itemsize    # stacked conv weights
                      + N_CAT * OUT_PAD * itemsize           # FC weight
                      + N_CAT * 4 + OUT_PAD * 4              # biases
                      + b_pad * OUT_PAD * 4)                 # output
    cost = pl.CostEstimate(flops=int(flops), transcendentals=0,
                           bytes_accessed=int(bytes_accessed))

    const2 = lambda i: (0, 0)

    out = pl.pallas_call(
        functools.partial(_textcnn_kernel, seq_valid=seq_len),
        out_shape=jax.ShapeDtypeStruct((b_pad, OUT_PAD), jnp.float32),
        grid=(b_pad // tb,),
        in_specs=[
            pl.BlockSpec((tb, l_pad, e), lambda i: (i, 0, 0)),           # activations: tiled over batch
            pl.BlockSpec((e, N_TAPS * N_FILTERS), const2),               # stacked conv weights (resident)
            pl.BlockSpec((1, N_CAT), const2),                            # packed conv biases
            pl.BlockSpec((N_CAT, OUT_PAD), const2),                      # FC weight (padded)
            pl.BlockSpec((1, OUT_PAD), const2),                          # FC bias (padded)
        ],
        out_specs=pl.BlockSpec((tb, OUT_PAD), lambda i: (i, 0)),
        compiler_params=pltpu.CompilerParams(
            dimension_semantics=("parallel",),
            vmem_limit_bytes=48 * 1024 * 1024,
        ),
        cost_estimate=cost,
    )(embedded, w_all, b_all, wfc, bfc)

    return out[:b, :OUTPUT_DIM]


def init_params(key):
    keys = jax.random.split(key, 9)
    emb = jax.random.normal(keys[0], (VOCAB_SIZE, EMBEDDING_DIM), jnp.float32) * 0.02
    emb = emb.at[PAD_IDX].set(0.0)  # padding_idx row is zero, as in nn.Embedding

    params = {'embedding': emb}
    for i, fs in enumerate(FILTER_SIZES):
        params[f'conv{fs}_w'] = (
            jax.random.normal(keys[1 + 2 * i], (fs, EMBEDDING_DIM, N_FILTERS), jnp.float32) * 0.05
        )
        params[f'conv{fs}_b'] = (
            jax.random.normal(keys[2 + 2 * i], (1, N_FILTERS), jnp.float32) * 0.05
        )
    params['fc_w'] = (
        jax.random.normal(keys[7], (N_CAT, OUTPUT_DIM), jnp.float32) * 0.05
    )
    params['fc_b'] = jax.random.normal(keys[8], (1, OUTPUT_DIM), jnp.float32) * 0.05
    return params


def reference_forward(text, params):
    """Pure-JAX f32 reference matching the PyTorch forward semantics."""
    embedded = jnp.take(params['embedding'], text, axis=0)  # (B, L, E)
    seq_len = embedded.shape[1]
    pooled = []
    for fs in FILTER_SIZES:
        w = params[f'conv{fs}_w']
        b = params[f'conv{fs}_b']
        l_out = seq_len - fs + 1
        conv = sum(
            jnp.einsum('ble,ef->blf', embedded[:, k:k + l_out, :], w[k])
            for k in range(fs)
        ) + b[None, :, :]
        conv = jax.nn.relu(conv)
        pooled.append(jnp.max(conv, axis=1))
    cat = jnp.concatenate(pooled, axis=-1)
    return cat @ params['fc_w'] + params['fc_b']


if __name__ == "__main__":
    key = jax.random.PRNGKey(0)
    pkey, tkey = jax.random.split(key)

    params = init_params(pkey)

    batch, seq_len = 2, 16
    text = jax.random.randint(tkey, (batch, seq_len), 0, VOCAB_SIZE, dtype=jnp.int32)

    ref = reference_forward(text, params)

    # Exact validation path (f32 operands): tight tolerance, checks roll/mask/pool structure.
    out_f32 = jax.block_until_ready(textcnn_forward(text, params, compute_dtype=jnp.float32))
    assert out_f32.shape == (batch, OUTPUT_DIM)
    assert jnp.allclose(out_f32, ref, rtol=1e-4, atol=1e-5), "f32 kernel/reference mismatch"

    # Production path (bf16 MXU operands, f32 accumulation): looser tolerance.
    out_bf16 = jax.block_until_ready(textcnn_forward(text, params))
    assert out_bf16.shape == (batch, OUTPUT_DIM)
    assert jnp.allclose(out_bf16, ref, rtol=5e-2, atol=5e-3), "bf16 kernel/reference mismatch"

    print("KERNEL_OK")
</pallas_src>

<mosaic_0001>
module attributes {stable_mosaic.version = 11 : i64} {
  func.func @_textcnn_kernel(%arg0: i32, %arg1: memref<8x16x128xf32, #tpu.memory_space<vmem>>, %arg2: memref<128x1536xf32, #tpu.memory_space<vmem>>, %arg3: memref<1x384xf32, #tpu.memory_space<vmem>>, %arg4: memref<384x128xf32, #tpu.memory_space<vmem>>, %arg5: memref<1x128xf32, #tpu.memory_space<vmem>>, %arg6: memref<8x128xf32, #tpu.memory_space<vmem>>) attributes {dimension_semantics = [#tpu.dimension_semantics<parallel>], iteration_bounds = array<i64: 1>, scalar_prefetch = 0 : i64, scratch_operands = 0 : i64, tpu.core_type = #tpu.core_type<tc>, window_params = [{transform_indices = @transform_0, window_bounds = array<i64: 8, 16, 128>}, {pipeline_mode = #tpu.pipeline_mode<synchronous>, transform_indices = @transform_1, window_bounds = array<i64: 128, 1536>}, {pipeline_mode = #tpu.pipeline_mode<synchronous>, transform_indices = @transform_2, window_bounds = array<i64: 1, 384>}, {pipeline_mode = #tpu.pipeline_mode<synchronous>, transform_indices = @transform_3, window_bounds = array<i64: 384, 128>}, {pipeline_mode = #tpu.pipeline_mode<synchronous>, transform_indices = @transform_4, window_bounds = array<i64: 1, 128>}, {transform_indices = @transform_5, window_bounds = array<i64: 8, 128>}]} {
    %c0 = arith.constant 0 : index
    %c0_0 = arith.constant 0 : index
    %c0_1 = arith.constant 0 : index
    %0 = vector.load %arg1[%c0, %c0_0, %c0_1] : memref<8x16x128xf32, #tpu.memory_space<vmem>>, vector<8x16x128xf32>
    %1 = vector.shape_cast %0 : vector<8x16x128xf32> to vector<128x128xf32>
    %c0_2 = arith.constant 0 : index
    %c0_3 = arith.constant 0 : index
    %2 = vector.load %arg2[%c0_2, %c0_3] : memref<128x1536xf32, #tpu.memory_space<vmem>>, vector<128x1536xf32>
    %cst = arith.constant dense<0.000000e+00> : vector<128x1536xf32>
    %3 = tpu.matmul %1, %2, %cst {dimension_numbers = #tpu.dot_dimension_numbers<[1], [0], [0], [1], [0, 0, 1, 1], [], []>} : vector<128x128xf32>, vector<128x1536xf32>, vector<128x1536xf32> -> vector<128x1536xf32>
    %4 = tpu.iota {dimensions = array<i32: 0>} : vector<16x128xi32>
    %c0_4 = arith.constant 0 : index
    %c0_5 = arith.constant 0 : index
    %5 = vector.load %arg3[%c0_4, %c0_5] : memref<1x384xf32, #tpu.memory_space<vmem>>, vector<1x128xf32>
    %6 = vector.extract_strided_slice %3 {offsets = [0, 0], sizes = [128, 128], strides = [1, 1]} : vector<128x1536xf32> to vector<128x128xf32>
    %7 = vector.extract_strided_slice %3 {offsets = [0, 128], sizes = [128, 128], strides = [1, 1]} : vector<128x1536xf32> to vector<128x128xf32>
    %c127_i32 = arith.constant 127 : i32
    %8 = tpu.dynamic_rotate %7 by %c127_i32 dim 0 : vector<128x128xf32>, i32 -> vector<128x128xf32>
    %9 = arith.addf %6, %8 : vector<128x128xf32>
    %10 = vector.extract_strided_slice %3 {offsets = [0, 256], sizes = [128, 128], strides = [1, 1]} : vector<128x1536xf32> to vector<128x128xf32>
    %c126_i32 = arith.constant 126 : i32
    %11 = tpu.dynamic_rotate %10 by %c126_i32 dim 0 : vector<128x128xf32>, i32 -> vector<128x128xf32>
    %12 = arith.addf %9, %11 : vector<128x128xf32>
    %13 = vector.shape_cast %12 : vector<128x128xf32> to vector<8x16x128xf32>
    %c14_i32 = arith.constant 14 : i32
    %14 = vector.broadcast %c14_i32 : i32 to vector<16x128xi32>
    %15 = arith.cmpi slt, %4, %14 : vector<16x128xi32>
    %cst_6 = arith.constant 0xFF800000 : f32
    %16 = vector.shape_cast %15 : vector<16x128xi1> to vector<1x16x128xi1>
    %17 = vector.broadcast %16 : vector<1x16x128xi1> to vector<8x16x128xi1>
    %18 = vector.broadcast %cst_6 : f32 to vector<8x16x128xf32>
    %19 = arith.select %17, %13, %18 : vector<8x16x128xi1>, vector<8x16x128xf32>
    %cst_7 = arith.constant dense<0xFF800000> : vector<8x128xf32>
    %20 = vector.multi_reduction <maximumf>, %19, %cst_7 [1] : vector<8x16x128xf32> to vector<8x128xf32>
    %21 = vector.broadcast %5 : vector<1x128xf32> to vector<8x128xf32>
    %22 = arith.addf %20, %21 : vector<8x128xf32>
    %cst_8 = arith.constant 0.000000e+00 : f32
    %23 = vector.broadcast %cst_8 : f32 to vector<8x128xf32>
    %24 = arith.maximumf %22, %23 : vector<8x128xf32>
    %c0_9 = arith.constant 0 : index
    %c128 = arith.constant 128 : index
    %25 = vector.load %arg3[%c0_9, %c128] : memref<1x384xf32, #tpu.memory_space<vmem>>, vector<1x128xf32>
    %26 = vector.extract_strided_slice %3 {offsets = [0, 384], sizes = [128, 128], strides = [1, 1]} : vector<128x1536xf32> to vector<128x128xf32>
    %27 = vector.extract_strided_slice %3 {offsets = [0, 512], sizes = [128, 128], strides = [1, 1]} : vector<128x1536xf32> to vector<128x128xf32>
    %c127_i32_10 = arith.constant 127 : i32
    %28 = tpu.dynamic_rotate %27 by %c127_i32_10 dim 0 : vector<128x128xf32>, i32 -> vector<128x128xf32>
    %29 = arith.addf %26, %28 : vector<128x128xf32>
    %30 = vector.extract_strided_slice %3 {offsets = [0, 640], sizes = [128, 128], strides = [1, 1]} : vector<128x1536xf32> to vector<128x128xf32>
    %c126_i32_11 = arith.constant 126 : i32
    %31 = tpu.dynamic_rotate %30 by %c126_i32_11 dim 0 : vector<128x128xf32>, i32 -> vector<128x128xf32>
    %32 = arith.addf %29, %31 : vector<128x128xf32>
    %33 = vector.extract_strided_slice %3 {offsets = [0, 768], sizes = [128, 128], strides = [1, 1]} : vector<128x1536xf32> to vector<128x128xf32>
    %c125_i32 = arith.constant 125 : i32
    %34 = tpu.dynamic_rotate %33 by %c125_i32 dim 0 : vector<128x128xf32>, i32 -> vector<128x128xf32>
    %35 = arith.addf %32, %34 : vector<128x128xf32>
    %36 = vector.shape_cast %35 : vector<128x128xf32> to vector<8x16x128xf32>
    %c13_i32 = arith.constant 13 : i32
    %37 = vector.broadcast %c13_i32 : i32 to vector<16x128xi32>
    %38 = arith.cmpi slt, %4, %37 : vector<16x128xi32>
    %cst_12 = arith.constant 0xFF800000 : f32
    %39 = vector.shape_cast %38 : vector<16x128xi1> to vector<1x16x128xi1>
    %40 = vector.broadcast %39 : vector<1x16x128xi1> to vector<8x16x128xi1>
    %41 = vector.broadcast %cst_12 : f32 to vector<8x16x128xf32>
    %42 = arith.select %40, %36, %41 : vector<8x16x128xi1>, vector<8x16x128xf32>
    %cst_13 = arith.constant dense<0xFF800000> : vector<8x128xf32>
    %43 = vector.multi_reduction <maximumf>, %42, %cst_13 [1] : vector<8x16x128xf32> to vector<8x128xf32>
    %44 = vector.broadcast %25 : vector<1x128xf32> to vector<8x128xf32>
    %45 = arith.addf %43, %44 : vector<8x128xf32>
    %cst_14 = arith.constant 0.000000e+00 : f32
    %46 = vector.broadcast %cst_14 : f32 to vector<8x128xf32>
    %47 = arith.maximumf %45, %46 : vector<8x128xf32>
    %c0_15 = arith.constant 0 : index
    %c256 = arith.constant 256 : index
    %48 = vector.load %arg3[%c0_15, %c256] : memref<1x384xf32, #tpu.memory_space<vmem>>, vector<1x128xf32>
    %49 = vector.extract_strided_slice %3 {offsets = [0, 896], sizes = [128, 128], strides = [1, 1]} : vector<128x1536xf32> to vector<128x128xf32>
    %50 = vector.extract_strided_slice %3 {offsets = [0, 1024], sizes = [128, 128], strides = [1, 1]} : vector<128x1536xf32> to vector<128x128xf32>
    %c127_i32_16 = arith.constant 127 : i32
    %51 = tpu.dynamic_rotate %50 by %c127_i32_16 dim 0 : vector<128x128xf32>, i32 -> vector<128x128xf32>
    %52 = arith.addf %49, %51 : vector<128x128xf32>
    %53 = vector.extract_strided_slice %3 {offsets = [0, 1152], sizes = [128, 128], strides = [1, 1]} : vector<128x1536xf32> to vector<128x128xf32>
    %c126_i32_17 = arith.constant 126 : i32
    %54 = tpu.dynamic_rotate %53 by %c126_i32_17 dim 0 : vector<128x128xf32>, i32 -> vector<128x128xf32>
    %55 = arith.addf %52, %54 : vector<128x128xf32>
    %56 = vector.extract_strided_slice %3 {offsets = [0, 1280], sizes = [128, 128], strides = [1, 1]} : vector<128x1536xf32> to vector<128x128xf32>
    %c125_i32_18 = arith.constant 125 : i32
    %57 = tpu.dynamic_rotate %56 by %c125_i32_18 dim 0 : vector<128x128xf32>, i32 -> vector<128x128xf32>
    %58 = arith.addf %55, %57 : vector<128x128xf32>
    %59 = vector.extract_strided_slice %3 {offsets = [0, 1408], sizes = [128, 128], strides = [1, 1]} : vector<128x1536xf32> to vector<128x128xf32>
    %c124_i32 = arith.constant 124 : i32
    %60 = tpu.dynamic_rotate %59 by %c124_i32 dim 0 : vector<128x128xf32>, i32 -> vector<128x128xf32>
    %61 = arith.addf %58, %60 : vector<128x128xf32>
    %62 = vector.shape_cast %61 : vector<128x128xf32> to vector<8x16x128xf32>
    %c12_i32 = arith.constant 12 : i32
    %63 = vector.broadcast %c12_i32 : i32 to vector<16x128xi32>
    %64 = arith.cmpi slt, %4, %63 : vector<16x128xi32>
    %cst_19 = arith.constant 0xFF800000 : f32
    %65 = vector.shape_cast %64 : vector<16x128xi1> to vector<1x16x128xi1>
    %66 = vector.broadcast %65 : vector<1x16x128xi1> to vector<8x16x128xi1>
    %67 = vector.broadcast %cst_19 : f32 to vector<8x16x128xf32>
    %68 = arith.select %66, %62, %67 : vector<8x16x128xi1>, vector<8x16x128xf32>
    %cst_20 = arith.constant dense<0xFF800000> : vector<8x128xf32>
    %69 = vector.multi_reduction <maximumf>, %68, %cst_20 [1] : vector<8x16x128xf32> to vector<8x128xf32>
    %70 = vector.broadcast %48 : vector<1x128xf32> to vector<8x128xf32>
    %71 = arith.addf %69, %70 : vector<8x128xf32>
    %cst_21 = arith.constant 0.000000e+00 : f32
    %72 = vector.broadcast %cst_21 : f32 to vector<8x128xf32>
    %73 = arith.maximumf %71, %72 : vector<8x128xf32>
    %c0_22 = arith.constant 0 : index
    %c0_23 = arith.constant 0 : index
    %74 = vector.load %arg4[%c0_22, %c0_23] : memref<384x128xf32, #tpu.memory_space<vmem>>, vector<128x128xf32>
    %cst_24 = arith.constant dense<0.000000e+00> : vector<8x128xf32>
    %75 = tpu.matmul %24, %74, %cst_24 {dimension_numbers = #tpu.dot_dimension_numbers<[1], [0], [0], [1], [0, 0, 1, 1], [], []>} : vector<8x128xf32>, vector<128x128xf32>, vector<8x128xf32> -> vector<8x128xf32>
    %c128_25 = arith.constant 128 : index
    %c0_26 = arith.constant 0 : index
    %76 = vector.load %arg4[%c128_25, %c0_26] : memref<384x128xf32, #tpu.memory_space<vmem>>, vector<128x128xf32>
    %cst_27 = arith.constant dense<0.000000e+00> : vector<8x128xf32>
    %77 = tpu.matmul %47, %76, %cst_27 {dimension_numbers = #tpu.dot_dimension_numbers<[1], [0], [0], [1], [0, 0, 1, 1], [], []>} : vector<8x128xf32>, vector<128x128xf32>, vector<8x128xf32> -> vector<8x128xf32>
    %78 = arith.addf %75, %77 : vector<8x128xf32>
    %c256_28 = arith.constant 256 : index
    %c0_29 = arith.constant 0 : index
    %79 = vector.load %arg4[%c256_28, %c0_29] : memref<384x128xf32, #tpu.memory_space<vmem>>, vector<128x128xf32>
    %cst_30 = arith.constant dense<0.000000e+00> : vector<8x128xf32>
    %80 = tpu.matmul %73, %79, %cst_30 {dimension_numbers = #tpu.dot_dimension_numbers<[1], [0], [0], [1], [0, 0, 1, 1], [], []>} : vector<8x128xf32>, vector<128x128xf32>, vector<8x128xf32> -> vector<8x128xf32>
    %81 = arith.addf %78, %80 : vector<8x128xf32>
    %c0_31 = arith.constant 0 : index
    %c0_32 = arith.constant 0 : index
    %82 = vector.load %arg5[%c0_31, %c0_32] : memref<1x128xf32, #tpu.memory_space<vmem>>, vector<1x128xf32>
    %83 = vector.broadcast %82 : vector<1x128xf32> to vector<8x128xf32>
    %84 = arith.addf %81, %83 : vector<8x128xf32>
    %c0_33 = arith.constant 0 : index
    %c0_34 = arith.constant 0 : index
    %85 = vector.load %arg6[%c0_33, %c0_34] : memref<8x128xf32, #tpu.memory_space<vmem>>, vector<8x128xf32>
    tpu.vector_store %arg6[%c0_33, %c0_34], %84 {strides = array<i32>} : memref<8x128xf32, #tpu.memory_space<vmem>>, vector<8x128xf32>,
    return
  }
  func.func @transform_0(%arg0: i32) -> (i32, i32, i32) {
    %c0_i32 = arith.constant 0 : i32
    %c0_i32_0 = arith.constant 0 : i32
    %c0_i32_1 = arith.constant 0 : i32
    return %arg0, %c0_i32, %c0_i32_0 : i32, i32, i32
  }
  func.func @transform_1(%arg0: i32) -> (i32, i32) {
    %c0_i32 = arith.constant 0 : i32
    %c0_i32_0 = arith.constant 0 : i32
    %c0_i32_1 = arith.constant 0 : i32
    return %c0_i32, %c0_i32_0 : i32, i32
  }
  func.func @transform_2(%arg0: i32) -> (i32, i32) {
    %c0_i32 = arith.constant 0 : i32
    %c0_i32_0 = arith.constant 0 : i32
    %c0_i32_1 = arith.constant 0 : i32
    return %c0_i32, %c0_i32_0 : i32, i32
  }
  func.func @transform_3(%arg0: i32) -> (i32, i32) {
    %c0_i32 = arith.constant 0 : i32
    %c0_i32_0 = arith.constant 0 : i32
    %c0_i32_1 = arith.constant 0 : i32
    return %c0_i32, %c0_i32_0 : i32, i32
  }
  func.func @transform_4(%arg0: i32) -> (i32, i32) {
    %c0_i32 = arith.constant 0 : i32
    %c0_i32_0 = arith.constant 0 : i32
    %c0_i32_1 = arith.constant 0 : i32
    return %c0_i32, %c0_i32_0 : i32, i32
  }
  func.func @transform_5(%arg0: i32) -> (i32, i32) {
    %c0_i32 = arith.constant 0 : i32
    %c0_i32_0 = arith.constant 0 : i32
    return %arg0, %c0_i32 : i32, i32
  }
}

</mosaic_0001>

<bundles_post_ra>
// kernel: tpu_custom_call.1
= control target key start
LH: loop header
LB: loop body
LE: loop exit
PB: predicated region body
PF: predicated region fallthrough
CT: control target
= control target key end

     0   :  { %10 = vsyncpa [#allocation3], 0  ;;  %s3922_s0 = inlined_call_operand.hbm [shape: f32[8,16,128], index: 0, kind: input, shape index: {}]   ;;  %s3923_s1 = inlined_call_operand.hbm [shape: f32[128,1536], index: 1, kind: input, shape index: {}]   ;;  %s3924_s2 = inlined_call_operand.vmem [shape: f32[1,384], index: 2, kind: input, shape index: {}]   ;;  %s3925_s3 = inlined_call_operand.hbm [shape: f32[384,128], index: 3, kind: input, shape index: {}]   ;;  %s3926_s4 = inlined_call_operand.vmem [shape: f32[1,128], index: 4, kind: input, shape index: {}]   ;;  %s3927_s5 = inlined_call_operand.hbm [shape: f32[8,128], index: 5, kind: output, shape index: {}]  }
   0x1   :  { %11 = vsyncpa [#allocation6], 0 }
   0x2   :  { %12 = vsyncpa [#allocation4], 0  ;;  %s2867_s18 = smov [#allocation5]   ;;  %s2773_s22 = scalar_lea.hbm %s3923_s1, 24576 }
   0x3   :  { %s30_s19 = sshll.u32 %s2867_s18, 4  ;;  %p2774_p0 = scmp.ne.s32.totalorder %s3923_s1, %s2773_s22  ;;  %s31_s19 = int_to_ptr.vmem [resolvable:$true] %s30_s19 }
   0x4   :  { %p2777_p1 = scmp.lt.u32.totalorder %s2773_s22, %s3923_s1 }
   0x6   :  { %p2779_p2 = pnand %p2777_p1, %p2774_p0 }
   0x8   :  { %2782 = shalt.err (!%p2779_p2)
}
   0x9   :  { %s2783_s27 = scalar_lea.vmem %s31_s19, 24576  ;;  %p2788_p4 = scmp.lt.s32.totalorder %s31_s19, %s31_s19 }
   0xa   :  { %p2784_p3 = scmp.ne.s32.totalorder %s31_s19, %s2783_s27  ;;  %p2789_p5 = scmp.lt.s32.totalorder %s2783_s27, %s2783_s27 }
   0xc   :  { %p2790_p6 = por %p2789_p5, %p2788_p4 }
   0xe   :  { %p2791_p7 = pnand %p2790_p6, %p2784_p3 }
  0x10   :  { %2794 = shalt.err (!%p2791_p7)
}
  0x11   :  { %s2868_s28 = smov 1536   ;;  %s2869_s29 = smov 96  }
  0x12   :  { %36 = dma.hbm_to_vmem [thread:$0]  %s3923_s1, 24576, %s31_s19, [#allocation6], %s2868_s28, %s2868_s28, %s2869_s29  }
  0x13   :  { %s2870_s7 = smov [#allocation2]   ;;  %s2795_s11 = scalar_lea.hbm %s3922_s0, 2048 }
  0x14   :  { %s18_s8 = sshll.u32 %s2870_s7, 4  ;;  %p2796_p8 = scmp.ne.s32.totalorder %s3922_s0, %s2795_s11  ;;  %s19_s8 = int_to_ptr.vmem [resolvable:$true] %s18_s8 }
  0x15   :  { %p2799_p9 = scmp.lt.u32.totalorder %s2795_s11, %s3922_s0 }
  0x17   :  { %p2801_p10 = pnand %p2799_p9, %p2796_p8 }
  0x19   :  { %2804 = shalt.err (!%p2801_p10)
}
  0x1a   :  { %s2805_s16 = scalar_lea.vmem %s19_s8, 2048  ;;  %p2810_p12 = scmp.lt.s32.totalorder %s19_s8, %s19_s8 }
  0x1b   :  { %p2806_p11 = scmp.ne.s32.totalorder %s19_s8, %s2805_s16  ;;  %p2811_p13 = scmp.lt.s32.totalorder %s2805_s16, %s2805_s16 }
  0x1d   :  { %p2812_p0 = por %p2811_p13, %p2810_p12 }
  0x1f   :  { %p2813_p1 = pnand %p2812_p0, %p2806_p11 }
  0x21   :  { %2816 = shalt.err (!%p2813_p1)
}
  0x22   :  { %s2871_s1 = smov 128   ;;  %s2872_s17 = smov 8  }
  0x23   :  { %24 = dma.hbm_to_vmem [thread:$0]  %s3922_s0, 2048, %s19_s8, [#allocation3], %s2871_s1, %s2871_s1, %s2872_s17  }
  0x24   :  { %s2873_s20 = smov [#allocation7]   ;;  %s2817_s24 = scalar_lea.hbm %s3925_s3, 6144 }
  0x25   :  { %s44_s21 = sshll.u32 %s2873_s20, 4  ;;  %p2818_p2 = scmp.ne.s32.totalorder %s3925_s3, %s2817_s24  ;;  %s45_s21 = int_to_ptr.vmem [resolvable:$true] %s44_s21 }
  0x26   :  { %p2821_p3 = scmp.lt.u32.totalorder %s2817_s24, %s3925_s3 }
  0x28   :  { %p2823_p4 = pnand %p2821_p3, %p2818_p2 }
  0x2a   :  { %2826 = shalt.err (!%p2823_p4)
}
  0x2b   :  { %s2827_s29 = scalar_lea.vmem %s45_s21, 6144  ;;  %p2832_p6 = scmp.lt.s32.totalorder %s45_s21, %s45_s21 }
  0x2c   :  { %p2828_p5 = scmp.ne.s32.totalorder %s45_s21, %s2827_s29  ;;  %p2833_p7 = scmp.lt.s32.totalorder %s2827_s29, %s2827_s29 }
  0x2e   :  { %p2834_p8 = por %p2833_p7, %p2832_p6 }
  0x30   :  { %p2835_p9 = pnand %p2834_p8, %p2828_p5 }
  0x32   :  { %2838 = shalt.err (!%p2835_p9)
}
  0x33   :  { %50 = dma.hbm_to_vmem [thread:$0]  %s3925_s3, 6144, %s45_s21, [#allocation6], %s2871_s1, %s2871_s1, %s2872_s17  }
  0x34   :  { %2861 = dma.done.wait [#allocation3], 2048  }
  0x35   :  { %2862 = vsyncadd [#allocation3], 4294965248 }
  0x36   :  { %2863 = dma.done.wait [#allocation6], 30720  }
  0x37   :  { %2864 = vsyncadd [#allocation6], 4294936576  ;;  %v3930_v0 = vmov 0.0   ;;  %v79_v1 = vld [vmem:[#allocation5 + $0x8] sm:$0xff]  ;;  %v81_v3 = vld [vmem:[#allocation5 + $0x18] sm:$0xff]  ;;  %vm2876_vm0 = vmmov 0  }
  0x38   :  { %334 = vmatprep.mubr.f32.mxu0 %v3930_v0  ;;  %495 = vmatprep.mubr.f32.mxu1 %v3930_v0  ;;  %v91_v2 = vld [vmem:[#allocation5 + $0x68] sm:$0xff]  ;;  %v93_v5 = vld [vmem:[#allocation5 + $0x78] sm:$0xff]  ;;  %v78_v6 = vld [vmem:[#allocation5] sm:$0xff]  ;;  %vm2019_vm4 = vcmask 1041409   ;;  %vm2022_vm5 = vcmask 1042434   ;;  %vm2025_vm6 = vcmask 1043459  }
  0x39   :  { %v2498_v4 = vpack.c.bf16 %v91_v2, %v79_v1  ;;  %v90_v7 = vld [vmem:[#allocation5 + $0x60] sm:$0xff]  ;;  %v2530_v8 = vpack.c.bf16 %v93_v5, %v81_v3  ;;  %v80_v10 = vld [vmem:[#allocation5 + $0x10] sm:$0xff]  ;;  %v103_v12 = vld [vmem:[#allocation5 + $0xc8] sm:$0xff]  ;;  %vm2028_vm8 = vcmask 1044484   ;;  %vm2031_vm9 = vcmask 1045509   ;;  %s2877_s12 = smov [#allocation8]  }
  0x3a   :  { %v2500_v9 = vpack.c.bf16 %v90_v7, %v78_v6  ;;  %v92_v11 = vld [vmem:[#allocation5 + $0x70] sm:$0xff]  ;;  %v115_v14 = vld [vmem:[#allocation5 + $0x128] sm:$0xff]  ;;  %v105_v15 = vld [vmem:[#allocation5 + $0xd8] sm:$0xff]  ;;  %vm2034_vm11 = vcmask 1046534   ;;  %vm2037_vm12 = vcmask 1047559   ;;  %s2328_s13 = sshll.u32 %s2877_s12, 4  ;;  %s2329_s13 = int_to_ptr.vmem [resolvable:$true] %s2328_s13 }
  0x3b   :  { %2499 = vmatprep.subr.bf16.mxu0 %v2498_v4  ;;  %v2532_v13 = vpack.c.bf16 %v92_v11, %v80_v10  ;;  %v117_v16 = vld [vmem:[#allocation5 + $0x138] sm:$0xff]  ;;  %2531 = vmatprep.subr.bf16.mxu1 %v2530_v8  ;;  %v2502_v17 = vpack.c.bf16 %v115_v14, %v103_v12  ;;  %v102_v19 = vld [vmem:[#allocation5 + $0xc0] sm:$0xff]  ;;  %v104_v21 = vld [vmem:[#allocation5 + $0xd0] sm:$0xff]  ;;  %s2839_s14 = scalar_lea.vmem %s2329_s13, 128  ;;  %p2844_p11 = scmp.lt.s32.totalorder %s2329_s13, %s2329_s13 }
  0x3c   :  { %2501 = vmatpush1.bf16.msra.mxu0 %v2500_v9  ;;  %v2534_v18 = vpack.c.bf16 %v117_v16, %v105_v15  ;;  %v114_v20 = vld [vmem:[#allocation5 + $0x120] sm:$0xff]  ;;  %v116_v23 = vld [vmem:[#allocation5 + $0x130] sm:$0xff]  ;;  %v127_v24 = vld [vmem:[#allocation5 + $0x188] sm:$0xff]  ;;  %p2840_p10 = scmp.ne.s32.totalorder %s2329_s13, %s2839_s14  ;;  %p2845_p12 = scmp.lt.s32.totalorder %s2839_s14, %s2839_s14 }
  0x3d   :  { %2533 = vmatpush1.bf16.msra.mxu1 %v2532_v13  ;;  %v2504_v22 = vpack.c.bf16 %v114_v20, %v102_v19  ;;  %v139_v25 = vld [vmem:[#allocation5 + $0x1e8] sm:$0xff]  ;;  %2503 = vmatprep.subr.bf16.mxu0 %v2502_v17  ;;  %v2536_v26 = vpack.c.bf16 %v116_v23, %v104_v21  ;;  %v129_v28 = vld [vmem:[#allocation5 + $0x198] sm:$0xff]  ;;  %v126_v30 = vld [vmem:[#allocation5 + $0x180] sm:$0xff] }
  0x3e   :  { %2535 = vmatprep.subr.bf16.mxu1 %v2534_v18  ;;  %v2506_v27 = vpack.c.bf16 %v139_v25, %v127_v24  ;;  %v141_v29 = vld [vmem:[#allocation5 + $0x1f8] sm:$0xff]  ;;  %v138_v32 = vld [vmem:[#allocation5 + $0x1e0] sm:$0xff]  ;;  %v128_v33 = vld [vmem:[#allocation5 + $0x190] sm:$0xff]  ;;  %p2846_p13 = por %p2845_p12, %p2844_p11 }
  0x3f   :  { %v2538_v31 = vpack.c.bf16 %v141_v29, %v129_v28  ;;  %v140_v34 = vld [vmem:[#allocation5 + $0x1f0] sm:$0xff]  ;;  %v2508_v35 = vpack.c.bf16 %v138_v32, %v126_v30  ;;  %v151_v36 = vld [vmem:[#allocation5 + $0x248] sm:$0xff]  ;;  %v153_v38 = vld [vmem:[#allocation5 + $0x258] sm:$0xff] }
  0x40   :  { %2505 = vmatpush1.bf16.msra.mxu0 %v2504_v22  ;;  %v163_v37 = vld [vmem:[#allocation5 + $0x2a8] sm:$0xff]  ;;  %v2540_v39 = vpack.c.bf16 %v140_v34, %v128_v33  ;;  %v165_v41 = vld [vmem:[#allocation5 + $0x2b8] sm:$0xff]  ;;  %v150_v42 = vld [vmem:[#allocation5 + $0x240] sm:$0xff]  ;;  %p2847_p0 = pnand %p2846_p13, %p2840_p10 }
  0x41   :  { %2537 = vmatpush1.bf16.msra.mxu1 %v2536_v26  ;;  %2507 = vmatprep.subr.bf16.mxu0 %v2506_v27  ;;  %v2510_v40 = vpack.c.bf16 %v163_v37, %v151_v36  ;;  %v162_v43 = vld [vmem:[#allocation5 + $0x2a0] sm:$0xff]  ;;  %v2542_v44 = vpack.c.bf16 %v165_v41, %v153_v38  ;;  %v152_v45 = vld [vmem:[#allocation5 + $0x250] sm:$0xff]  ;;  %v175_v47 = vld [vmem:[#allocation5 + $0x308] sm:$0xff] }
  0x42   :  { %2539 = vmatprep.subr.bf16.mxu1 %v2538_v31  ;;  %v164_v46 = vld [vmem:[#allocation5 + $0x2b0] sm:$0xff]  ;;  %v187_v48 = vld [vmem:[#allocation5 + $0x368] sm:$0xff]  ;;  %v177_v49 = vld [vmem:[#allocation5 + $0x318] sm:$0xff]  ;;  %v2512_v51 = vpack.c.bf16 %v162_v43, %v150_v42 }
  0x43   :  { %v189_v50 = vld [vmem:[#allocation5 + $0x378] sm:$0xff]  ;;  %v2544_v52 = vpack.c.bf16 %v164_v46, %v152_v45  ;;  %v2514_v53 = vpack.c.bf16 %v187_v48, %v175_v47  ;;  %v174_v54 = vld [vmem:[#allocation5 + $0x300] sm:$0xff]  ;;  %v176_v56 = vld [vmem:[#allocation5 + $0x310] sm:$0xff] }
  0x44   :  { %2509 = vmatpush1.bf16.msra.mxu0 %v2508_v35  ;;  %v186_v55 = vld [vmem:[#allocation5 + $0x360] sm:$0xff]  ;;  %v2546_v57 = vpack.c.bf16 %v189_v50, %v177_v49  ;;  %v188_v58 = vld [vmem:[#allocation5 + $0x370] sm:$0xff]  ;;  %v199_v59 = vld [vmem:[#allocation5 + $0x3c8] sm:$0xff] }
  0x45   :  { %2541 = vmatpush1.bf16.msra.mxu1 %v2540_v39  ;;  %2511 = vmatprep.subr.bf16.mxu0 %v2510_v40  ;;  %v211_v60 = vld [vmem:[#allocation5 + $0x428] sm:$0xff]  ;;  %v201_v61 = vld [vmem:[#allocation5 + $0x3d8] sm:$0xff]  ;;  %v2516_v63 = vpack.c.bf16 %v186_v55, %v174_v54  ;;  %v2548_v1 = vpack.c.bf16 %v188_v58, %v176_v56  ;;  %v198_v3 = vld [vmem:[#allocation5 + $0x3c0] sm:$0xff] }
  0x46   :  { %2543 = vmatprep.subr.bf16.mxu1 %v2542_v44  ;;  %v213_v62 = vld [vmem:[#allocation5 + $0x438] sm:$0xff]  ;;  %v2518_v2 = vpack.c.bf16 %v211_v60, %v199_v59  ;;  %v210_v4 = vld [vmem:[#allocation5 + $0x420] sm:$0xff]  ;;  %v200_v5 = vld [vmem:[#allocation5 + $0x3d0] sm:$0xff] }
  0x47   :  { %v2550_v6 = vpack.c.bf16 %v213_v62, %v201_v61  ;;  %v212_v7 = vld [vmem:[#allocation5 + $0x430] sm:$0xff]  ;;  %v223_v8 = vld [vmem:[#allocation5 + $0x488] sm:$0xff]  ;;  %v225_v10 = vld [vmem:[#allocation5 + $0x498] sm:$0xff]  ;;  %v2520_v12 = vpack.c.bf16 %v210_v4, %v198_v3 }
  0x48   :  { %2513 = vmatpush1.bf16.msra.mxu0 %v2512_v51  ;;  %v235_v9 = vld [vmem:[#allocation5 + $0x4e8] sm:$0xff]  ;;  %v237_v11 = vld [vmem:[#allocation5 + $0x4f8] sm:$0xff]  ;;  %v2552_v13 = vpack.c.bf16 %v212_v7, %v200_v5  ;;  %v222_v15 = vld [vmem:[#allocation5 + $0x480] sm:$0xff] }
  0x49   :  { %2545 = vmatpush1.bf16.msra.mxu1 %v2544_v52  ;;  %2515 = vmatprep.subr.bf16.mxu0 %v2514_v53  ;;  %v2522_v14 = vpack.c.bf16 %v235_v9, %v223_v8  ;;  %v234_v16 = vld [vmem:[#allocation5 + $0x4e0] sm:$0xff]  ;;  %v224_v17 = vld [vmem:[#allocation5 + $0x490] sm:$0xff]  ;;  %v2554_v18 = vpack.c.bf16 %v237_v11, %v225_v10  ;;  %v247_v20 = vld [vmem:[#allocation5 + $0x548] sm:$0xff] }
  0x4a   :  { %2547 = vmatprep.subr.bf16.mxu1 %v2546_v57  ;;  %v236_v19 = vld [vmem:[#allocation5 + $0x4f0] sm:$0xff]  ;;  %v259_v21 = vld [vmem:[#allocation5 + $0x5a8] sm:$0xff]  ;;  %v249_v22 = vld [vmem:[#allocation5 + $0x558] sm:$0xff]  ;;  %v2524_v24 = vpack.c.bf16 %v234_v16, %v222_v15 }
  0x4b   :  { %v261_v23 = vld [vmem:[#allocation5 + $0x5b8] sm:$0xff]  ;;  %v2556_v25 = vpack.c.bf16 %v236_v19, %v224_v17  ;;  %v2526_v26 = vpack.c.bf16 %v259_v21, %v247_v20  ;;  %v246_v27 = vld [vmem:[#allocation5 + $0x540] sm:$0xff]  ;;  %v248_v29 = vld [vmem:[#allocation5 + $0x550] sm:$0xff] }
  0x4c   :  { %2517 = vmatpush1.bf16.msra.mxu0 %v2516_v63  ;;  %v258_v28 = vld [vmem:[#allocation5 + $0x5a0] sm:$0xff]  ;;  %v2558_v30 = vpack.c.bf16 %v261_v23, %v249_v22  ;;  %v260_v31 = vld [vmem:[#allocation5 + $0x5b0] sm:$0xff]  ;;  %v83_v32 = vld [vmem:[#allocation5 + $0x28] sm:$0xff] }
  0x4d   :  { %2549 = vmatpush1.bf16.msra.mxu1 %v2548_v1  ;;  %2519 = vmatprep.subr.bf16.mxu0 %v2518_v2  ;;  %v95_v33 = vld [vmem:[#allocation5 + $0x88] sm:$0xff]  ;;  %v85_v34 = vld [vmem:[#allocation5 + $0x38] sm:$0xff]  ;;  %v2528_v36 = vpack.c.bf16 %v258_v28, %v246_v27  ;;  %v2560_v37 = vpack.c.bf16 %v260_v31, %v248_v29  ;;  %v82_v39 = vld [vmem:[#allocation5 + $0x20] sm:$0xff] }
  0x4e   :  { %2551 = vmatprep.subr.bf16.mxu1 %v2550_v6  ;;  %v97_v35 = vld [vmem:[#allocation5 + $0x98] sm:$0xff]  ;;  %v2562_v38 = vpack.c.bf16 %v95_v33, %v83_v32  ;;  %v94_v40 = vld [vmem:[#allocation5 + $0x80] sm:$0xff]  ;;  %v84_v42 = vld [vmem:[#allocation5 + $0x30] sm:$0xff] }
  0x4f   :  { %v2594_v41 = vpack.c.bf16 %v97_v35, %v85_v34  ;;  %v96_v43 = vld [vmem:[#allocation5 + $0x90] sm:$0xff]  ;;  %v107_v44 = vld [vmem:[#allocation5 + $0xe8] sm:$0xff]  ;;  %v2946_v46 = vld [vmem:[#allocation2] sm:$0xff]  ;;  %v2564_v47 = vpack.c.bf16 %v94_v40, %v82_v39 }
  0x50   :  { %2521 = vmatpush1.bf16.msra.mxu0 %v2520_v12  ;;  %v119_v45 = vld [vmem:[#allocation5 + $0x148] sm:$0xff]  ;;  %v109_v48 = vld [vmem:[#allocation5 + $0xf8] sm:$0xff]  ;;  %v2596_v50 = vpack.c.bf16 %v96_v43, %v84_v42  ;;  %v106_v52 = vld [vmem:[#allocation5 + $0xe0] sm:$0xff] }
  0x51   :  { %2553 = vmatpush1.bf16.msra.mxu1 %v2552_v13  ;;  %2523 = vmatprep.subr.bf16.mxu0 %v2522_v14  ;;  %v121_v49 = vld [vmem:[#allocation5 + $0x158] sm:$0xff]  ;;  %v2566_v51 = vpack.c.bf16 %v119_v45, %v107_v44  ;;  %v118_v53 = vld [vmem:[#allocation5 + $0x140] sm:$0xff]  ;;  %v108_v54 = vld [vmem:[#allocation5 + $0xf0] sm:$0xff] }
  0x52   :  { %2555 = vmatprep.subr.bf16.mxu1 %v2554_v18  ;;  %v2598_v55 = vpack.c.bf16 %v121_v49, %v109_v48  ;;  %v120_v56 = vld [vmem:[#allocation5 + $0x150] sm:$0xff]  ;;  %v131_v57 = vld [vmem:[#allocation5 + $0x1a8] sm:$0xff]  ;;  %v133_v60 = vld [vmem:[#allocation5 + $0x1b8] sm:$0xff]  ;;  %v2568_v62 = vpack.c.bf16 %v118_v53, %v106_v52 }
  0x53   :  { %v143_v58 = vld [vmem:[#allocation5 + $0x208] sm:$0xff]  ;;  %v145_v61 = vld [vmem:[#allocation5 + $0x218] sm:$0xff]  ;;  %v2600_v63 = vpack.c.bf16 %v120_v56, %v108_v54  ;;  %v130_v2 = vld [vmem:[#allocation5 + $0x1a0] sm:$0xff] }
  0x54   :  { %2525 = vmatpush1.bf16.msra.mxu0 %v2524_v24  ;;  %v2950_v59 = vld [vmem:[#allocation2 + $0x8] sm:$0xff]  ;;  %v2570_v1 = vpack.c.bf16 %v143_v58, %v131_v57  ;;  %v142_v3 = vld [vmem:[#allocation5 + $0x200] sm:$0xff]  ;;  %v132_v4 = vld [vmem:[#allocation5 + $0x1b0] sm:$0xff]  ;;  %v2602_v5 = vpack.c.bf16 %v145_v61, %v133_v60 }
  0x55   :  { %2557 = vmatpush1.bf16.msra.mxu1 %v2556_v25  ;;  %2527 = vmatprep.subr.bf16.mxu0 %v2526_v26  ;;  %v144_v6 = vld [vmem:[#allocation5 + $0x210] sm:$0xff]  ;;  %v155_v7 = vld [vmem:[#allocation5 + $0x268] sm:$0xff]  ;;  %v157_v10 = vld [vmem:[#allocation5 + $0x278] sm:$0xff]  ;;  %v2572_v12 = vpack.c.bf16 %v142_v3, %v130_v2 }
  0x56   :  { %2559 = vmatprep.subr.bf16.mxu1 %v2558_v30  ;;  %v167_v8 = vld [vmem:[#allocation5 + $0x2c8] sm:$0xff]  ;;  %v2957_v9 = vld [vmem:[#allocation2 + $0x10] sm:$0xff]  ;;  %v169_v11 = vld [vmem:[#allocation5 + $0x2d8] sm:$0xff]  ;;  %v2604_v13 = vpack.c.bf16 %v144_v6, %v132_v4 }
  0x57   :  { %v2574_v14 = vpack.c.bf16 %v167_v8, %v155_v7  ;;  %v154_v15 = vld [vmem:[#allocation5 + $0x260] sm:$0xff]  ;;  %v156_v17 = vld [vmem:[#allocation5 + $0x270] sm:$0xff]  ;;  %v2606_v18 = vpack.c.bf16 %v169_v11, %v157_v10  ;;  %v179_v20 = vld [vmem:[#allocation5 + $0x328] sm:$0xff] }
  0x58   :  { %2529 = vmatpush1.bf16.msra.mxu0 %v2528_v36  ;;  %v166_v16 = vld [vmem:[#allocation5 + $0x2c0] sm:$0xff]  ;;  %v168_v19 = vld [vmem:[#allocation5 + $0x2d0] sm:$0xff]  ;;  %v191_v21 = vld [vmem:[#allocation5 + $0x388] sm:$0xff] }
  0x59   :  { %2561 = vmatpush1.bf16.msra.mxu1 %v2560_v37  ;;  %2563 = vmatprep.subr.bf16.mxu0 %v2562_v38  ;;  %v2963_v22 = vld [vmem:[#allocation2 + $0x18] sm:$0xff]  ;;  %v2576_v25 = vpack.c.bf16 %v166_v16, %v154_v15  ;;  %v2608_v26 = vpack.c.bf16 %v168_v19, %v156_v17  ;;  %v2578_v27 = vpack.c.bf16 %v191_v21, %v179_v20  ;;  %v178_v28 = vld [vmem:[#allocation5 + $0x320] sm:$0xff]  ;;  %v180_v30 = vld [vmem:[#allocation5 + $0x330] sm:$0xff] }
  0x5a   :  { %2595 = vmatprep.subr.bf16.mxu1 %v2594_v41  ;;  %v181_v23 = vld [vmem:[#allocation5 + $0x338] sm:$0xff]  ;;  %v190_v29 = vld [vmem:[#allocation5 + $0x380] sm:$0xff]  ;;  %v192_v32 = vld [vmem:[#allocation5 + $0x390] sm:$0xff] }
  0x5b   :  { %335 = vmatmul.mubr.f32.vlgmr.msra.gmra.mrb[0].mxu0 %v2946_v46  ;;  %v193_v24 = vld [vmem:[#allocation5 + $0x398] sm:$0xff]  ;;  %v203_v33 = vld [vmem:[#allocation5 + $0x3e8] sm:$0xff]  ;;  %v2969_v35 = vld [vmem:[#allocation2 + $0x20] sm:$0xff]  ;;  %v2580_v38 = vpack.c.bf16 %v190_v29, %v178_v28  ;;  %v2612_v39 = vpack.c.bf16 %v192_v32, %v180_v30 }
  0x5c   :  { %496 = vmatmul.mubr.f32.vlgmr.msra.gmra.mrb[0].mxu1 %v2946_v46  ;;  %2565 = vmatpush1.bf16.msra.mxu0 %v2564_v47  ;;  %v2610_v31 = vpack.c.bf16 %v193_v24, %v181_v23  ;;  %v215_v34 = vld [vmem:[#allocation5 + $0x448] sm:$0xff]  ;;  %v205_v36 = vld [vmem:[#allocation5 + $0x3f8] sm:$0xff]  ;;  %v202_v41 = vld [vmem:[#allocation5 + $0x3e0] sm:$0xff] }
  0x5d   :  { %340 = vmatprep.mubr.f32.mxu0 %v3930_v0  ;;  %501 = vmatprep.mubr.f32.mxu1 %v3930_v0  ;;  %v217_v37 = vld [vmem:[#allocation5 + $0x458] sm:$0xff]  ;;  %v2582_v40 = vpack.c.bf16 %v215_v34, %v203_v33  ;;  %v214_v42 = vld [vmem:[#allocation5 + $0x440] sm:$0xff]  ;;  %v204_v43 = vld [vmem:[#allocation5 + $0x3f0] sm:$0xff] }
  0x5e   :  { %2597 = vmatpush1.bf16.msra.mxu1 %v2596_v50  ;;  %2567 = vmatprep.subr.bf16.mxu0 %v2566_v51  ;;  %v2614_v44 = vpack.c.bf16 %v217_v37, %v205_v36  ;;  %v216_v45 = vld [vmem:[#allocation5 + $0x450] sm:$0xff]  ;;  %v227_v47 = vld [vmem:[#allocation5 + $0x4a8] sm:$0xff]  ;;  %v229_v50 = vld [vmem:[#allocation5 + $0x4b8] sm:$0xff]  ;;  %v2584_v52 = vpack.c.bf16 %v214_v42, %v202_v41 }
  0x5f   :  { %341 = vmatmul.mubr.f32.gmra.mrb[2].mxu0 %v2950_v59  ;;  %2599 = vmatprep.subr.bf16.mxu1 %v2598_v55  ;;  %v239_v48 = vld [vmem:[#allocation5 + $0x508] sm:$0xff]  ;;  %v241_v51 = vld [vmem:[#allocation5 + $0x518] sm:$0xff]  ;;  %v2616_v53 = vpack.c.bf16 %v216_v45, %v204_v43  ;;  %v226_v55 = vld [vmem:[#allocation5 + $0x4a0] sm:$0xff] }
  0x60   :  { %502 = vmatmul.mubr.f32.gmra.mrb[2].mxu1 %v2950_v59  ;;  %346 = vmatprep.mubr.f32.mxu0 %v3930_v0  ;;  %v2975_v49 = vld [vmem:[#allocation2 + $0x28] sm:$0xff]  ;;  %v2586_v54 = vpack.c.bf16 %v239_v48, %v227_v47  ;;  %v238_v56 = vld [vmem:[#allocation5 + $0x500] sm:$0xff]  ;;  %v228_v57 = vld [vmem:[#allocation5 + $0x4b0] sm:$0xff]  ;;  %v2618_v58 = vpack.c.bf16 %v241_v51, %v229_v50 }
  0x61   :  { %507 = vmatprep.mubr.f32.mxu1 %v3930_v0  ;;  %2569 = vmatpush1.bf16.msra.mxu0 %v2568_v62  ;;  %v240_v60 = vld [vmem:[#allocation5 + $0x510] sm:$0xff]  ;;  %v251_v61 = vld [vmem:[#allocation5 + $0x568] sm:$0xff]  ;;  %v265_v2 = vld [vmem:[#allocation5 + $0x5d8] sm:$0xff]  ;;  %v2588_v3 = vpack.c.bf16 %v238_v56, %v226_v55 }
  0x62   :  { %2601 = vmatpush1.bf16.msra.mxu1 %v2600_v63  ;;  %2571 = vmatprep.subr.bf16.mxu0 %v2570_v1  ;;  %v263_v62 = vld [vmem:[#allocation5 + $0x5c8] sm:$0xff]  ;;  %v2981_v63 = vld [vmem:[#allocation2 + $0x30] sm:$0xff]  ;;  %v253_v1 = vld [vmem:[#allocation5 + $0x578] sm:$0xff]  ;;  %v2620_v4 = vpack.c.bf16 %v240_v60, %v228_v57 }
  0x63   :  { %347 = vmatmul.mubr.f32.gmra.mrb[4].mxu0 %v2957_v9  ;;  %2603 = vmatprep.subr.bf16.mxu1 %v2602_v5  ;;  %v2590_v5 = vpack.c.bf16 %v263_v62, %v251_v61  ;;  %v250_v6 = vld [vmem:[#allocation5 + $0x560] sm:$0xff]  ;;  %v252_v8 = vld [vmem:[#allocation5 + $0x570] sm:$0xff]  ;;  %v2622_v10 = vpack.c.bf16 %v265_v2, %v253_v1  ;;  %v89_v15 = vld [vmem:[#allocation5 + $0x58] sm:$0xff] }
  0x64   :  { %508 = vmatmul.mubr.f32.gmra.mrb[4].mxu1 %v2957_v9  ;;  %352 = vmatprep.mubr.f32.mxu0 %v3930_v0  ;;  %v262_v7 = vld [vmem:[#allocation5 + $0x5c0] sm:$0xff]  ;;  %v264_v11 = vld [vmem:[#allocation5 + $0x5d0] sm:$0xff]  ;;  %v101_v16 = vld [vmem:[#allocation5 + $0xb8] sm:$0xff] }
  0x65   :  { %513 = vmatprep.mubr.f32.mxu1 %v3930_v0  ;;  %2573 = vmatpush1.bf16.msra.mxu0 %v2572_v12  ;;  %v87_v12 = vld [vmem:[#allocation5 + $0x48] sm:$0xff]  ;;  %v2592_v17 = vpack.c.bf16 %v262_v7, %v250_v6  ;;  %v2658_v20 = vpack.c.bf16 %v101_v16, %v89_v15  ;;  %v2993_v21 = vld [vmem:[#allocation2 + $0x40] sm:$0xff]  ;;  %v3005_v24 = vld [vmem:[#allocation2 + $0x50] sm:$0xff] }
  0x66   :  { %2605 = vmatpush1.bf16.msra.mxu1 %v2604_v13  ;;  %2575 = vmatprep.subr.bf16.mxu0 %v2574_v14  ;;  %v99_v13 = vld [vmem:[#allocation5 + $0xa8] sm:$0xff]  ;;  %v2987_v14 = vld [vmem:[#allocation2 + $0x38] sm:$0xff]  ;;  %v3029_v28 = vld [vmem:[#allocation2 + $0x70] sm:$0xff] }
  0x67   :  { %353 = vmatmul.mubr.f32.gmra.mrb[6].mxu0 %v2963_v22  ;;  %2607 = vmatprep.subr.bf16.mxu1 %v2606_v18  ;;  %v2624_v18 = vpack.c.bf16 %v264_v11, %v252_v8  ;;  %v2626_v19 = vpack.c.bf16 %v99_v13, %v87_v12  ;;  %v2999_v23 = vld [vmem:[#allocation2 + $0x48] sm:$0xff]  ;;  %v3035_v29 = vld [vmem:[#allocation2 + $0x78] sm:$0xff]  ;;  %v86_v30 = vld [vmem:[#allocation5 + $0x40] sm:$0xff] }
  0x68   :  { %514 = vmatmul.mubr.f32.gmra.mrb[6].mxu1 %v2963_v22  ;;  %358 = vmatprep.mubr.f32.mxu0 %v3930_v0  ;;  %v88_v32 = vld [vmem:[#allocation5 + $0x50] sm:$0xff]  ;;  %v111_v34 = vld [vmem:[#allocation5 + $0x108] sm:$0xff]  ;;  %v110_v42 = vld [vmem:[#allocation5 + $0x100] sm:$0xff] }
  0x69   :  { %519 = vmatprep.mubr.f32.mxu1 %v3930_v0  ;;  %2577 = vmatpush1.bf16.msra.mxu0 %v2576_v25  ;;  %v3011_v25 = vld [vmem:[#allocation2 + $0x58] sm:$0xff]  ;;  %v100_v33 = vld [vmem:[#allocation5 + $0xb0] sm:$0xff]  ;;  %v123_v36 = vld [vmem:[#allocation5 + $0x168] sm:$0xff] }
  0x6a   :  { %2609 = vmatpush1.bf16.msra.mxu1 %v2608_v26  ;;  %2579 = vmatprep.subr.bf16.mxu0 %v2578_v27  ;;  %v3017_v26 = vld [vmem:[#allocation2 + $0x60] sm:$0xff]  ;;  %v3023_v27 = vld [vmem:[#allocation2 + $0x68] sm:$0xff]  ;;  %v2630_v41 = vpack.c.bf16 %v123_v36, %v111_v34  ;;  %v124_v47 = vld [vmem:[#allocation5 + $0x170] sm:$0xff] }
  0x6b   :  { %359 = vmatmul.mubr.f32.gmra.mrb[8].mxu0 %v2969_v35  ;;  %2611 = vmatprep.subr.bf16.mxu1 %v2610_v31  ;;  %v98_v31 = vld [vmem:[#allocation5 + $0xa0] sm:$0xff]  ;;  %v135_v48 = vld [vmem:[#allocation5 + $0x1c8] sm:$0xff]  ;;  %v137_v51 = vld [vmem:[#allocation5 + $0x1d8] sm:$0xff] }
  0x6c   :  { %520 = vmatmul.mubr.f32.gmra.mrb[8].mxu1 %v2969_v35  ;;  %364 = vmatprep.mubr.f32.mxu0 %v3930_v0  ;;  %v2628_v37 = vpack.c.bf16 %v98_v31, %v86_v30  ;;  %v122_v43 = vld [vmem:[#allocation5 + $0x160] sm:$0xff]  ;;  %v147_v50 = vld [vmem:[#allocation5 + $0x228] sm:$0xff]  ;;  %v148_v61 = vld [vmem:[#allocation5 + $0x230] sm:$0xff] }
  0x6d   :  { %525 = vmatprep.mubr.f32.mxu1 %v3930_v0  ;;  %2581 = vmatpush1.bf16.msra.mxu0 %v2580_v38  ;;  %v113_v38 = vld [vmem:[#allocation5 + $0x118] sm:$0xff]  ;;  %v2634_v55 = vpack.c.bf16 %v147_v50, %v135_v48  ;;  %v134_v56 = vld [vmem:[#allocation5 + $0x1c0] sm:$0xff]  ;;  %v159_v62 = vld [vmem:[#allocation5 + $0x288] sm:$0xff] }
  0x6e   :  { %2613 = vmatpush1.bf16.msra.mxu1 %v2612_v39  ;;  %2583 = vmatprep.subr.bf16.mxu0 %v2582_v40  ;;  %v125_v39 = vld [vmem:[#allocation5 + $0x178] sm:$0xff]  ;;  %v2660_v40 = vpack.c.bf16 %v100_v33, %v88_v32  ;;  %v146_v57 = vld [vmem:[#allocation5 + $0x220] sm:$0xff]  ;;  %v171_v1 = vld [vmem:[#allocation5 + $0x2e8] sm:$0xff] }
  0x6f   :  { %365 = vmatmul.mubr.f32.gmra.mrb[10].mxu0 %v2975_v49  ;;  %2615 = vmatprep.subr.bf16.mxu1 %v2614_v44  ;;  %v112_v44 = vld [vmem:[#allocation5 + $0x110] sm:$0xff]  ;;  %v2662_v45 = vpack.c.bf16 %v125_v39, %v113_v38  ;;  %v161_v2 = vld [vmem:[#allocation5 + $0x298] sm:$0xff]  ;;  %v2638_v6 = vpack.c.bf16 %v171_v1, %v159_v62  ;;  %v158_v7 = vld [vmem:[#allocation5 + $0x280] sm:$0xff] }
  0x70   :  { %526 = vmatmul.mubr.f32.gmra.mrb[10].mxu1 %v2975_v49  ;;  %370 = vmatprep.mubr.f32.mxu0 %v3930_v0  ;;  %v170_v8 = vld [vmem:[#allocation5 + $0x2e0] sm:$0xff]  ;;  %v172_v12 = vld [vmem:[#allocation5 + $0x2f0] sm:$0xff]  ;;  %v183_v13 = vld [vmem:[#allocation5 + $0x348] sm:$0xff] }
  0x71   :  { %531 = vmatprep.mubr.f32.mxu1 %v3930_v0  ;;  %2585 = vmatpush1.bf16.msra.mxu0 %v2584_v52  ;;  %v149_v52 = vld [vmem:[#allocation5 + $0x238] sm:$0xff]  ;;  %v195_v15 = vld [vmem:[#allocation5 + $0x3a8] sm:$0xff]  ;;  %v182_v30 = vld [vmem:[#allocation5 + $0x340] sm:$0xff] }
  0x72   :  { %2617 = vmatpush1.bf16.msra.mxu1 %v2616_v53  ;;  %2587 = vmatprep.subr.bf16.mxu0 %v2586_v54  ;;  %v2632_v53 = vpack.c.bf16 %v122_v43, %v110_v42  ;;  %v2664_v54 = vpack.c.bf16 %v124_v47, %v112_v44  ;;  %v2666_v60 = vpack.c.bf16 %v149_v52, %v137_v51  ;;  %v185_v16 = vld [vmem:[#allocation5 + $0x358] sm:$0xff]  ;;  %v194_v31 = vld [vmem:[#allocation5 + $0x3a0] sm:$0xff]  ;;  %v184_v32 = vld [vmem:[#allocation5 + $0x350] sm:$0xff] }
  0x73   :  { %371 = vmatmul.mubr.f32.gmra.mrb[12].mxu0 %v2981_v63  ;;  %2619 = vmatprep.subr.bf16.mxu1 %v2618_v58  ;;  %v136_v58 = vld [vmem:[#allocation5 + $0x1d0] sm:$0xff]  ;;  %v207_v36 = vld [vmem:[#allocation5 + $0x408] sm:$0xff]  ;;  %v209_v38 = vld [vmem:[#allocation5 + $0x418] sm:$0xff] }
  0x74   :  { %532 = vmatmul.mubr.f32.gmra.mrb[12].mxu1 %v2981_v63  ;;  %376 = vmatprep.mubr.f32.mxu0 %v3930_v0  ;;  %v196_v34 = vld [vmem:[#allocation5 + $0x3b0] sm:$0xff]  ;;  %v221_v39 = vld [vmem:[#allocation5 + $0x478] sm:$0xff]  ;;  %v206_v43 = vld [vmem:[#allocation5 + $0x400] sm:$0xff] }
  0x75   :  { %537 = vmatprep.mubr.f32.mxu1 %v3930_v0  ;;  %2589 = vmatpush1.bf16.msra.mxu0 %v2588_v3  ;;  %v173_v3 = vld [vmem:[#allocation5 + $0x2f8] sm:$0xff]  ;;  %v218_v44 = vld [vmem:[#allocation5 + $0x460] sm:$0xff]  ;;  %v2678_v47 = vpack.c.bf16 %v221_v39, %v209_v38  ;;  %v220_v48 = vld [vmem:[#allocation5 + $0x470] sm:$0xff] }
  0x76   :  { %2621 = vmatpush1.bf16.msra.mxu1 %v2620_v4  ;;  %2591 = vmatprep.subr.bf16.mxu0 %v2590_v5  ;;  %v2636_v4 = vpack.c.bf16 %v146_v57, %v134_v56  ;;  %v2668_v5 = vpack.c.bf16 %v148_v61, %v136_v58  ;;  %v2670_v11 = vpack.c.bf16 %v173_v3, %v161_v2  ;;  %v231_v50 = vld [vmem:[#allocation5 + $0x4c8] sm:$0xff]  ;;  %v233_v52 = vld [vmem:[#allocation5 + $0x4d8] sm:$0xff]  ;;  %v230_v57 = vld [vmem:[#allocation5 + $0x4c0] sm:$0xff] }
  0x77   :  { %377 = vmatmul.mubr.f32.gmra.mrb[14].mxu0 %v2987_v14  ;;  %2623 = vmatprep.subr.bf16.mxu1 %v2622_v10  ;;  %v160_v10 = vld [vmem:[#allocation5 + $0x290] sm:$0xff]  ;;  %v243_v51 = vld [vmem:[#allocation5 + $0x528] sm:$0xff]  ;;  %v242_v58 = vld [vmem:[#allocation5 + $0x520] sm:$0xff] }
  0x78   :  { %538 = vmatmul.mubr.f32.gmra.mrb[14].mxu1 %v2987_v14  ;;  %382 = vmatprep.mubr.f32.mxu0 %v3930_v0  ;;  %v2650_v56 = vpack.c.bf16 %v243_v51, %v231_v50  ;;  %v244_v62 = vld [vmem:[#allocation5 + $0x530] sm:$0xff]  ;;  %v255_v1 = vld [vmem:[#allocation5 + $0x588] sm:$0xff]  ;;  %v257_v3 = vld [vmem:[#allocation5 + $0x598] sm:$0xff] }
  0x79   :  { %543 = vmatprep.mubr.f32.mxu1 %v3930_v0  ;;  %2593 = vmatpush1.bf16.msra.mxu0 %v2592_v17  ;;  %v197_v17 = vld [vmem:[#allocation5 + $0x3b8] sm:$0xff]  ;;  %v267_v2 = vld [vmem:[#allocation5 + $0x5e8] sm:$0xff] }
  0x7a   :  { %2625 = vmatpush1.bf16.msra.mxu1 %v2624_v18  ;;  %2627 = vmatprep.subr.bf16.mxu0 %v2626_v19  ;;  %v2640_v18 = vpack.c.bf16 %v170_v8, %v158_v7  ;;  %v2672_v19 = vpack.c.bf16 %v172_v12, %v160_v10  ;;  %v2674_v33 = vpack.c.bf16 %v197_v17, %v185_v16  ;;  %v254_v8 = vld [vmem:[#allocation5 + $0x580] sm:$0xff]  ;;  %v256_v12 = vld [vmem:[#allocation5 + $0x590] sm:$0xff]  ;;  %v1991_v38 = vld [vmem:[#allocation7 + $0x68] sm:$0xff] }
  0x7b   :  { %383 = vmatmul.mubr.f32.gmra.mrb[16].mxu0 %v2993_v21  ;;  %2659 = vmatprep.subr.bf16.mxu1 %v2658_v20  ;;  %v2642_v20 = vpack.c.bf16 %v195_v15, %v183_v13  ;;  %v2654_v7 = vpack.c.bf16 %v267_v2, %v255_v1  ;;  %v266_v10 = vld [vmem:[#allocation5 + $0x5e0] sm:$0xff]  ;;  %v268_v13 = vld [vmem:[#allocation5 + $0x5f0] sm:$0xff] }
  0x7c   :  { %544 = vmatmul.mubr.f32.gmra.mrb[16].mxu1 %v2993_v21  ;;  %388 = vmatprep.mubr.f32.mxu0 %v3930_v0  ;;  %v2656_v15 = vpack.c.bf16 %v266_v10, %v254_v8  ;;  %v2688_v16 = vpack.c.bf16 %v268_v13, %v256_v12 }
  0x7d   :  { %549 = vmatprep.mubr.f32.mxu1 %v3930_v0 }
  0x7f   :  { %389 = vmatmul.mubr.f32.gmra.mrb[18].mxu0 %v2999_v23 }
  0x80   :  { %550 = vmatmul.mubr.f32.gmra.mrb[18].mxu1 %v2999_v23  ;;  %394 = vmatprep.mubr.f32.mxu0 %v3930_v0 }
  0x81   :  { %555 = vmatprep.mubr.f32.mxu1 %v3930_v0 }
  0x83   :  { %395 = vmatmul.mubr.f32.gmra.mrb[20].mxu0 %v3005_v24 }
  0x84   :  { %556 = vmatmul.mubr.f32.gmra.mrb[20].mxu1 %v3005_v24  ;;  %400 = vmatprep.mubr.f32.mxu0 %v3930_v0 }
  0x85   :  { %561 = vmatprep.mubr.f32.mxu1 %v3930_v0 }
  0x87   :  { %401 = vmatmul.mubr.f32.gmra.mrb[22].mxu0 %v3011_v25 }
  0x88   :  { %562 = vmatmul.mubr.f32.gmra.mrb[22].mxu1 %v3011_v25  ;;  %406 = vmatprep.mubr.f32.mxu0 %v3930_v0 }
  0x89   :  { %567 = vmatprep.mubr.f32.mxu1 %v3930_v0 }
  0x8b   :  { %407 = vmatmul.mubr.f32.gmra.mrb[24].mxu0 %v3017_v26 }
  0x8c   :  { %568 = vmatmul.mubr.f32.gmra.mrb[24].mxu1 %v3017_v26  ;;  %412 = vmatprep.mubr.f32.mxu0 %v3930_v0 }
  0x8d   :  { %573 = vmatprep.mubr.f32.mxu1 %v3930_v0 }
  0x8f   :  { %413 = vmatmul.mubr.f32.gmra.mrb[26].mxu0 %v3023_v27 }
  0x90   :  { %574 = vmatmul.mubr.f32.gmra.mrb[26].mxu1 %v3023_v27  ;;  %418 = vmatprep.mubr.f32.mxu0 %v3930_v0 }
  0x91   :  { %579 = vmatprep.mubr.f32.mxu1 %v3930_v0 }
  0x93   :  { %419 = vmatmul.mubr.f32.gmra.mrb[28].mxu0 %v3029_v28 }
  0x94   :  { %580 = vmatmul.mubr.f32.gmra.mrb[28].mxu1 %v3029_v28  ;;  %424 = vmatprep.mubr.f32.mxu0 %v3930_v0 }
  0x95   :  { %585 = vmatprep.mubr.f32.mxu1 %v3930_v0 }
  0x97   :  { %425 = vmatmul.mubr.f32.gmra.mrb[30].mxu0 %v3035_v29 }
  0x98   :  { %586 = vmatmul.mubr.f32.gmra.mrb[30].mxu1 %v3035_v29  ;;  %656 = vmatprep.mubr.f32.mxu0 %v3930_v0 }
  0x99   :  { %817 = vmatprep.mubr.f32.mxu1 %v3930_v0 }
  0x9b   :  { %657 = vmatmul.mubr.f32.vlgmr.msra.gmra.mrb[32].mxu0 %v2946_v46 }
  0x9c   :  { %818 = vmatmul.mubr.f32.vlgmr.msra.gmra.mrb[32].mxu1 %v2946_v46  ;;  %2629 = vmatpush1.bf16.msra.mxu0 %v2628_v37  ;;  %v219_v37 = vld [vmem:[#allocation5 + $0x468] sm:$0xff] }
  0x9d   :  { %662 = vmatprep.mubr.f32.mxu0 %v3930_v0  ;;  %823 = vmatprep.mubr.f32.mxu1 %v3930_v0  ;;  %v2646_v42 = vpack.c.bf16 %v219_v37, %v207_v36  ;;  %v1989_v36 = vld [vmem:[#allocation7 + $0x58] sm:$0xff] }
  0x9e   :  { %2661 = vmatpush1.bf16.msra.mxu1 %v2660_v40  ;;  %2631 = vmatprep.subr.bf16.mxu0 %v2630_v41  ;;  %v2644_v40 = vpack.c.bf16 %v194_v31, %v182_v30  ;;  %v2676_v41 = vpack.c.bf16 %v196_v34, %v184_v32  ;;  %v1985_v31 = vld [vmem:[#allocation7 + $0x38] sm:$0xff] }
  0x9f   :  { %663 = vmatmul.mubr.f32.gmra.mrb[34].mxu0 %v2950_v59  ;;  %2663 = vmatprep.subr.bf16.mxu1 %v2662_v45  ;;  %v208_v45 = vld [vmem:[#allocation5 + $0x410] sm:$0xff] }
  0xa0   :  { %824 = vmatmul.mubr.f32.gmra.mrb[34].mxu1 %v2950_v59  ;;  %668 = vmatprep.mubr.f32.mxu0 %v3930_v0 }
  0xa1   :  { %829 = vmatprep.mubr.f32.mxu1 %v3930_v0  ;;  %2633 = vmatpush1.bf16.msra.mxu0 %v2632_v53  ;;  %v245_v53 = vld [vmem:[#allocation5 + $0x538] sm:$0xff] }
  0xa2   :  { %2665 = vmatpush1.bf16.msra.mxu1 %v2664_v54  ;;  %2635 = vmatprep.subr.bf16.mxu0 %v2634_v55  ;;  %v2648_v54 = vpack.c.bf16 %v218_v44, %v206_v43  ;;  %v2680_v55 = vpack.c.bf16 %v220_v48, %v208_v45  ;;  %v2682_v61 = vpack.c.bf16 %v245_v53, %v233_v52  ;;  %v1997_v43 = vld [vmem:[#allocation7 + $0x98] sm:$0xff] }
  0xa3   :  { %669 = vmatmul.mubr.f32.gmra.mrb[36].mxu0 %v2957_v9  ;;  %2667 = vmatprep.subr.bf16.mxu1 %v2666_v60  ;;  %v232_v60 = vld [vmem:[#allocation5 + $0x4d0] sm:$0xff] }
  0xa4   :  { %830 = vmatmul.mubr.f32.gmra.mrb[36].mxu1 %v2957_v9  ;;  %674 = vmatprep.mubr.f32.mxu0 %v3930_v0 }
  0xa5   :  { %835 = vmatprep.mubr.f32.mxu1 %v3930_v0  ;;  %2637 = vmatpush1.bf16.msra.mxu0 %v2636_v4  ;;  %v269_v4 = vld [vmem:[#allocation5 + $0x5f8] sm:$0xff] }
  0xa6   :  { %2669 = vmatpush1.bf16.msra.mxu1 %v2668_v5  ;;  %2639 = vmatprep.subr.bf16.mxu0 %v2638_v6  ;;  %v2652_v5 = vpack.c.bf16 %v242_v58, %v230_v57  ;;  %v2684_v6 = vpack.c.bf16 %v244_v62, %v232_v60 }
  0xa7   :  { %675 = vmatmul.mubr.f32.gmra.mrb[38].mxu0 %v2963_v22  ;;  %2671 = vmatprep.subr.bf16.mxu1 %v2670_v11  ;;  %v2686_v11 = vpack.c.bf16 %v269_v4, %v257_v3 }
  0xa8   :  { %836 = vmatmul.mubr.f32.gmra.mrb[38].mxu1 %v2963_v22  ;;  %680 = vmatprep.mubr.f32.mxu0 %v3930_v0 }
  0xa9   :  { %841 = vmatprep.mubr.f32.mxu1 %v3930_v0  ;;  %2641 = vmatpush1.bf16.msra.mxu0 %v2640_v18  ;;  %v3928_v18 = vmov 0.0|0.0  }
  0xaa   :  { %2673 = vmatpush1.bf16.msra.mxu1 %v2672_v19  ;;  %2643 = vmatprep.subr.bf16.mxu0 %v2642_v20  ;;  %v1983_v20 = vld [vmem:[#allocation7 + $0x28] sm:$0xff] }
  0xab   :  { %681 = vmatmul.mubr.f32.gmra.mrb[40].mxu0 %v2969_v35  ;;  %2675 = vmatprep.subr.bf16.mxu1 %v2674_v33  ;;  %v1987_v33 = vld [vmem:[#allocation7 + $0x48] sm:$0xff] }
  0xac   :  { %842 = vmatmul.mubr.f32.gmra.mrb[40].mxu1 %v2969_v35  ;;  %686 = vmatprep.mubr.f32.mxu0 %v3930_v0 }
  0xad   :  { %847 = vmatprep.mubr.f32.mxu1 %v3930_v0  ;;  %2645 = vmatpush1.bf16.msra.mxu0 %v2644_v40  ;;  %v1993_v40 = vld [vmem:[#allocation7 + $0x78] sm:$0xff] }
  0xae   :  { %2677 = vmatpush1.bf16.msra.mxu1 %v2676_v41  ;;  %2647 = vmatprep.subr.bf16.mxu0 %v2646_v42  ;;  %v1996_v42 = vld [vmem:[#allocation7 + $0x90] sm:$0xff] }
  0xaf   :  { %687 = vmatmul.mubr.f32.gmra.mrb[42].mxu0 %v2975_v49  ;;  %2679 = vmatprep.subr.bf16.mxu1 %v2678_v47  ;;  %v2694_v47 = vpack.c.bf16 %v1997_v43, %v1996_v42 }
  0xb0   :  { %848 = vmatmul.mubr.f32.gmra.mrb[42].mxu1 %v2975_v49  ;;  %692 = vmatprep.mubr.f32.mxu0 %v3930_v0 }
  0xb1   :  { %853 = vmatprep.mubr.f32.mxu1 %v3930_v0  ;;  %2649 = vmatpush1.bf16.msra.mxu0 %v2648_v54  ;;  %v1998_v54 = vld [vmem:[#allocation7 + $0xa0] sm:$0xff] }
  0xb2   :  { %2681 = vmatpush1.bf16.msra.mxu1 %v2680_v55  ;;  %2651 = vmatprep.subr.bf16.mxu0 %v2650_v56  ;;  %v1999_v55 = vld [vmem:[#allocation7 + $0xa8] sm:$0xff] }
  0xb3   :  { %693 = vmatmul.mubr.f32.gmra.mrb[44].mxu0 %v2981_v63  ;;  %2683 = vmatprep.subr.bf16.mxu1 %v2682_v61  ;;  %v2697_v61 = vpack.c.bf16 %v1999_v55, %v1998_v54  ;;  %v2007_v54 = vld [vmem:[#allocation7 + $0xe8] sm:$0xff] }
  0xb4   :  { %854 = vmatmul.mubr.f32.gmra.mrb[44].mxu1 %v2981_v63  ;;  %698 = vmatprep.mubr.f32.mxu0 %v3930_v0 }
  0xb5   :  { %859 = vmatprep.mubr.f32.mxu1 %v3930_v0  ;;  %2653 = vmatpush1.bf16.msra.mxu0 %v2652_v5 }
  0xb6   :  { %2685 = vmatpush1.bf16.msra.mxu1 %v2684_v6  ;;  %2655 = vmatprep.subr.bf16.mxu0 %v2654_v7  ;;  %v2000_v6 = vld [vmem:[#allocation7 + $0xb0] sm:$0xff]  ;;  %v2001_v7 = vld [vmem:[#allocation7 + $0xb8] sm:$0xff] }
  0xb7   :  { %699 = vmatmul.mubr.f32.gmra.mrb[46].mxu0 %v2987_v14  ;;  %2687 = vmatprep.subr.bf16.mxu1 %v2686_v11  ;;  %v2700_v13 = vpack.c.bf16 %v2001_v7, %v2000_v6 }
  0xb8   :  { %860 = vmatmul.mubr.f32.gmra.mrb[46].mxu1 %v2987_v14  ;;  %704 = vmatprep.mubr.f32.mxu0 %v3930_v0 }
  0xb9   :  { %865 = vmatprep.mubr.f32.mxu1 %v3930_v0  ;;  %2657 = vmatpush1.bf16.msra.mxu0 %v2656_v15 }
  0xba   :  { %2689 = vmatpush1.bf16.msra.mxu1 %v2688_v16  ;;  %2690 = vmatprep.subr.bf16.mxu0 %v3928_v18 }
  0xbb   :  { %705 = vmatmul.mubr.f32.gmra.mrb[48].mxu0 %v2993_v21  ;;  %2714 = vmatprep.subr.bf16.mxu1 %v3928_v18 }
  0xbc   :  { %866 = vmatmul.mubr.f32.gmra.mrb[48].mxu1 %v2993_v21  ;;  %710 = vmatprep.mubr.f32.mxu0 %v3930_v0 }
  0xbd   :  { %871 = vmatprep.mubr.f32.mxu1 %v3930_v0 }
  0xbf   :  { %711 = vmatmul.mubr.f32.gmra.mrb[50].mxu0 %v2999_v23 }
  0xc0   :  { %872 = vmatmul.mubr.f32.gmra.mrb[50].mxu1 %v2999_v23  ;;  %716 = vmatprep.mubr.f32.mxu0 %v3930_v0 }
  0xc1   :  { %877 = vmatprep.mubr.f32.mxu1 %v3930_v0 }
  0xc3   :  { %717 = vmatmul.mubr.f32.gmra.mrb[52].mxu0 %v3005_v24 }
  0xc4   :  { %878 = vmatmul.mubr.f32.gmra.mrb[52].mxu1 %v3005_v24  ;;  %722 = vmatprep.mubr.f32.mxu0 %v3930_v0 }
  0xc5   :  { %883 = vmatprep.mubr.f32.mxu1 %v3930_v0 }
  0xc7   :  { %723 = vmatmul.mubr.f32.gmra.mrb[54].mxu0 %v3011_v25 }
  0xc8   :  { %884 = vmatmul.mubr.f32.gmra.mrb[54].mxu1 %v3011_v25  ;;  %728 = vmatprep.mubr.f32.mxu0 %v3930_v0 }
  0xc9   :  { %889 = vmatprep.mubr.f32.mxu1 %v3930_v0 }
  0xcb   :  { %729 = vmatmul.mubr.f32.gmra.mrb[56].mxu0 %v3017_v26 }
  0xcc   :  { %890 = vmatmul.mubr.f32.gmra.mrb[56].mxu1 %v3017_v26  ;;  %734 = vmatprep.mubr.f32.mxu0 %v3930_v0 }
  0xcd   :  { %895 = vmatprep.mubr.f32.mxu1 %v3930_v0 }
  0xcf   :  { %735 = vmatmul.mubr.f32.gmra.mrb[58].mxu0 %v3023_v27 }
  0xd0   :  { %896 = vmatmul.mubr.f32.gmra.mrb[58].mxu1 %v3023_v27  ;;  %740 = vmatprep.mubr.f32.mxu0 %v3930_v0 }
  0xd1   :  { %901 = vmatprep.mubr.f32.mxu1 %v3930_v0 }
  0xd3   :  { %741 = vmatmul.mubr.f32.gmra.mrb[60].mxu0 %v3029_v28 }
  0xd4   :  { %902 = vmatmul.mubr.f32.gmra.mrb[60].mxu1 %v3029_v28  ;;  %746 = vmatprep.mubr.f32.mxu0 %v3930_v0 }
  0xd5   :  { %907 = vmatprep.mubr.f32.mxu1 %v3930_v0 }
  0xd7   :  { %747 = vmatmul.mubr.f32.gmra.mrb[62].mxu0 %v3035_v29 }
  0xd8   :  { %908 = vmatmul.mubr.f32.gmra.mrb[62].mxu1 %v3035_v29  ;;  %978 = vmatprep.mubr.f32.mxu0 %v3930_v0 }
  0xd9   :  { %1139 = vmatprep.mubr.f32.mxu1 %v3930_v0 }
  0xdb   :  { %979 = vmatmul.mubr.f32.vlgmr.msra.gmra.mrb[64].mxu0 %v2946_v46 }
  0xdc   :  { %1140 = vmatmul.mubr.f32.vlgmr.msra.gmra.mrb[64].mxu1 %v2946_v46  ;;  %984 = vmatprep.mubr.f32.mxu0 %v3930_v0  ;;  %v1978_v46 = vld [vmem:[#allocation7] sm:$0xff] }
  0xdd   :  { %1145 = vmatprep.mubr.f32.mxu1 %v3930_v0 }
  0xdf   :  { %985 = vmatmul.mubr.f32.gmra.mrb[66].mxu0 %v2950_v59 }
  0xe0   :  { %1146 = vmatmul.mubr.f32.gmra.mrb[66].mxu1 %v2950_v59  ;;  %990 = vmatprep.mubr.f32.mxu0 %v3930_v0  ;;  %v1979_v59 = vld [vmem:[#allocation7 + $0x8] sm:$0xff] }
  0xe1   :  { %1151 = vmatprep.mubr.f32.mxu1 %v3930_v0  ;;  %v2715_v17 = vpack.c.bf16 %v1979_v59, %v1978_v46 }
  0xe3   :  { %991 = vmatmul.mubr.f32.gmra.mrb[68].mxu0 %v2957_v9  ;;  %2716 = vmatpush3.bf16.msra.mxu1 %v2715_v17 }
  0xe4   :  { %1152 = vmatmul.mubr.f32.gmra.mrb[68].mxu1 %v2957_v9  ;;  %996 = vmatprep.mubr.f32.mxu0 %v3930_v0  ;;  %v1980_v9 = vld [vmem:[#allocation7 + $0x10] sm:$0xff] }
  0xe5   :  { %1157 = vmatprep.mubr.f32.mxu1 %v3930_v0  ;;  %2717 = vmatprep.subr.bf16.mxu1 %v3928_v18 }
  0xe7   :  { %997 = vmatmul.mubr.f32.gmra.mrb[70].mxu0 %v2963_v22 }
  0xe8   :  { %1158 = vmatmul.mubr.f32.gmra.mrb[70].mxu1 %v2963_v22  ;;  %1002 = vmatprep.mubr.f32.mxu0 %v3930_v0  ;;  %v1981_v22 = vld [vmem:[#allocation7 + $0x18] sm:$0xff] }
  0xe9   :  { %1163 = vmatprep.mubr.f32.mxu1 %v3930_v0  ;;  %v2718_v19 = vpack.c.bf16 %v1981_v22, %v1980_v9 }
  0xeb   :  { %1003 = vmatmul.mubr.f32.gmra.mrb[72].mxu0 %v2969_v35  ;;  %2719 = vmatpush3.bf16.msra.mxu1 %v2718_v19  ;;  %v2002_v19 = vld [vmem:[#allocation7 + $0xc0] sm:$0xff] }
  0xec   :  { %1164 = vmatmul.mubr.f32.gmra.mrb[72].mxu1 %v2969_v35  ;;  %1008 = vmatprep.mubr.f32.mxu0 %v3930_v0  ;;  %v1982_v35 = vld [vmem:[#allocation7 + $0x20] sm:$0xff] }
  0xed   :  { %1169 = vmatprep.mubr.f32.mxu1 %v3930_v0  ;;  %2720 = vmatprep.subr.bf16.mxu1 %v3928_v18  ;;  %v2721_v30 = vpack.c.bf16 %v1983_v20, %v1982_v35  ;;  %v2003_v35 = vld [vmem:[#allocation7 + $0xc8] sm:$0xff] }
  0xef   :  { %1009 = vmatmul.mubr.f32.gmra.mrb[74].mxu0 %v2975_v49  ;;  %2722 = vmatpush3.bf16.msra.mxu1 %v2721_v30 }
  0xf0   :  { %1170 = vmatmul.mubr.f32.gmra.mrb[74].mxu1 %v2975_v49  ;;  %1014 = vmatprep.mubr.f32.mxu0 %v3930_v0  ;;  %v1984_v49 = vld [vmem:[#allocation7 + $0x30] sm:$0xff] }
  0xf1   :  { %1175 = vmatprep.mubr.f32.mxu1 %v3930_v0  ;;  %2723 = vmatprep.subr.bf16.mxu1 %v3928_v18  ;;  %v2724_v32 = vpack.c.bf16 %v1985_v31, %v1984_v49  ;;  %v2703_v31 = vpack.c.bf16 %v2003_v35, %v2002_v19 }
  0xf3   :  { %1015 = vmatmul.mubr.f32.gmra.mrb[76].mxu0 %v2981_v63  ;;  %2725 = vmatpush3.bf16.msra.mxu1 %v2724_v32 }
  0xf4   :  { %1176 = vmatmul.mubr.f32.gmra.mrb[76].mxu1 %v2981_v63  ;;  %1020 = vmatprep.mubr.f32.mxu0 %v3930_v0  ;;  %v1986_v63 = vld [vmem:[#allocation7 + $0x40] sm:$0xff] }
  0xf5   :  { %1181 = vmatprep.mubr.f32.mxu1 %v3930_v0  ;;  %2726 = vmatprep.subr.bf16.mxu1 %v3928_v18  ;;  %v2727_v34 = vpack.c.bf16 %v1987_v33, %v1986_v63 }
  0xf7   :  { %1021 = vmatmul.mubr.f32.gmra.mrb[78].mxu0 %v2987_v14  ;;  %2728 = vmatpush3.bf16.msra.mxu1 %v2727_v34 }
  0xf8   :  { %1182 = vmatmul.mubr.f32.gmra.mrb[78].mxu1 %v2987_v14  ;;  %1026 = vmatprep.mubr.f32.mxu0 %v3930_v0  ;;  %v1988_v14 = vld [vmem:[#allocation7 + $0x50] sm:$0xff] }
  0xf9   :  { %1187 = vmatprep.mubr.f32.mxu1 %v3930_v0  ;;  %2729 = vmatprep.subr.bf16.mxu1 %v3928_v18  ;;  %v2730_v37 = vpack.c.bf16 %v1989_v36, %v1988_v14 }
  0xfb   :  { %1027 = vmatmul.mubr.f32.gmra.mrb[80].mxu0 %v2993_v21  ;;  %2731 = vmatpush3.bf16.msra.mxu1 %v2730_v37 }
  0xfc   :  { %1188 = vmatmul.mubr.f32.gmra.mrb[80].mxu1 %v2993_v21  ;;  %1032 = vmatprep.mubr.f32.mxu0 %v3930_v0  ;;  %v1990_v21 = vld [vmem:[#allocation7 + $0x60] sm:$0xff] }
  0xfd   :  { %1193 = vmatprep.mubr.f32.mxu1 %v3930_v0  ;;  %2732 = vmatprep.subr.bf16.mxu1 %v3928_v18  ;;  %v2733_v39 = vpack.c.bf16 %v1991_v38, %v1990_v21  ;;  %v2004_v38 = vld [vmem:[#allocation7 + $0xd0] sm:$0xff] }
  0xff   :  { %1033 = vmatmul.mubr.f32.gmra.mrb[82].mxu0 %v2999_v23  ;;  %2734 = vmatpush3.bf16.msra.mxu1 %v2733_v39  ;;  %v2005_v39 = vld [vmem:[#allocation7 + $0xd8] sm:$0xff] }
 0x100   :  { %1194 = vmatmul.mubr.f32.gmra.mrb[82].mxu1 %v2999_v23  ;;  %1038 = vmatprep.mubr.f32.mxu0 %v3930_v0  ;;  %v1992_v23 = vld [vmem:[#allocation7 + $0x70] sm:$0xff] }
 0x101   :  { %1199 = vmatprep.mubr.f32.mxu1 %v3930_v0  ;;  %2735 = vmatprep.subr.bf16.mxu1 %v3928_v18  ;;  %v2736_v41 = vpack.c.bf16 %v1993_v40, %v1992_v23 }
 0x103   :  { %1039 = vmatmul.mubr.f32.gmra.mrb[84].mxu0 %v3005_v24  ;;  %2737 = vmatpush3.bf16.msra.mxu1 %v2736_v41 }
 0x104   :  { %1200 = vmatmul.mubr.f32.gmra.mrb[84].mxu1 %v3005_v24  ;;  %1044 = vmatprep.mubr.f32.mxu0 %v3930_v0  ;;  %v1994_v24 = vld [vmem:[#allocation7 + $0x80] sm:$0xff] }
 0x105   :  { %1205 = vmatprep.mubr.f32.mxu1 %v3930_v0 }
 0x107   :  { %1045 = vmatmul.mubr.f32.gmra.mrb[86].mxu0 %v3011_v25 }
 0x108   :  { %1206 = vmatmul.mubr.f32.gmra.mrb[86].mxu1 %v3011_v25  ;;  %1050 = vmatprep.mubr.f32.mxu0 %v3930_v0  ;;  %v1995_v25 = vld [vmem:[#allocation7 + $0x88] sm:$0xff] }
 0x109   :  { %1211 = vmatprep.mubr.f32.mxu1 %v3930_v0 }
 0x10b   :  { %1051 = vmatmul.mubr.f32.gmra.mrb[88].mxu0 %v3017_v26 }
 0x10c   :  { %1212 = vmatmul.mubr.f32.gmra.mrb[88].mxu1 %v3017_v26  ;;  %1056 = vmatprep.mubr.f32.mxu0 %v3930_v0  ;;  %v1236_v26 = vlaneseq }
 0x10d   :  { %1217 = vmatprep.mubr.f32.mxu1 %v3930_v0 }
 0x10e   :  { %v3186_v45 = vshrl.u32 %v1236_v26, 7  ;;  %v2706_v26 = vpack.c.bf16 %v2005_v39, %v2004_v38 }
 0x10f   :  { %1057 = vmatmul.mubr.f32.gmra.mrb[90].mxu0 %v3023_v27 }
 0x110   :  { %1218 = vmatmul.mubr.f32.gmra.mrb[90].mxu1 %v3023_v27  ;;  %1062 = vmatprep.mubr.f32.mxu0 %v3930_v0  ;;  %v2691_v27 = vpack.c.bf16 %v1995_v25, %v1994_v24  ;;  %vm1256_vm1 = vcmp.lt.s32.totalorder %v3186_v45, 7  ;;  %vm1305_vm2 = vcmp.lt.s32.totalorder %v3186_v45, 6  ;;  %v3207_v10 = vadd.s32 8, %v3186_v45 }
 0x111   :  { %1223 = vmatprep.mubr.f32.mxu1 %v3930_v0  ;;  %vm1551_vm7 = vcmp.lt.s32.totalorder %v3186_v45, 5  ;;  %vm1845_vm13 = vcmp.lt.s32.totalorder %v3186_v45, 4 }
 0x112   :  { %2692 = vmatpush3.bf16.msra.mxu0 %v2691_v27  ;;  %vm1339_vm3 = vcmp.lt.s32.totalorder %v3207_v10, 14  ;;  %vm1585_vm10 = vcmp.lt.s32.totalorder %v3207_v10, 13  ;;  %vm1879_vm14 = vcmp.lt.s32.totalorder %v3207_v10, 12 }
 0x113   :  { %1063 = vmatmul.mubr.f32.gmra.mrb[92].mxu0 %v3029_v28  ;;  %2693 = vmatprep.subr.bf16.mxu0 %v3928_v18 }
 0x114   :  { %1224 = vmatmul.mubr.f32.gmra.mrb[92].mxu1 %v3029_v28  ;;  %1068 = vmatprep.mubr.f32.mxu0 %v3930_v0 }
 0x115   :  { %1229 = vmatprep.mubr.f32.mxu1 %v3930_v0 }
 0x116   :  { %2695 = vmatpush3.bf16.msra.mxu0 %v2694_v47 }
 0x117   :  { %1069 = vmatmul.mubr.f32.gmra.mrb[94].mxu0 %v3035_v29  ;;  %2696 = vmatprep.subr.bf16.mxu0 %v3928_v18 }
 0x118   :  { %1230 = vmatmul.mubr.f32.gmra.mrb[94].mxu1 %v3035_v29  ;;  %2425 = vmatprep.mubr.msk.f32.mxu0 %vm2876_vm0, %v3930_v0 }
 0x119   :  { %2460 = vmatprep.mubr.msk.f32.mxu1 %vm2876_vm0, %v3930_v0 }
 0x11a   :  { %2698 = vmatpush3.bf16.msra.mxu0 %v2697_v61 }
 0x11b   :  { %2699 = vmatprep.subr.bf16.mxu0 %v3928_v18 }
 0x11e   :  { %2701 = vmatpush3.bf16.msra.mxu0 %v2700_v13  ;;  %v2008_v13 = vld [vmem:[#allocation7 + $0xf0] sm:$0xff] }
 0x11f   :  { %2702 = vmatprep.subr.bf16.mxu0 %v3928_v18 }
 0x122   :  { %2704 = vmatpush3.bf16.msra.mxu0 %v2703_v31 }
 0x123   :  { %2705 = vmatprep.subr.bf16.mxu0 %v3928_v18 }
 0x126   :  { %2707 = vmatpush3.bf16.msra.mxu0 %v2706_v26 }
 0x127   :  { %2708 = vmatprep.subr.bf16.mxu0 %v3928_v18 }
 0x12e   :  { %v336_v28 = vpop.f32.mrb[0].mxu0 }
 0x12f   :  { %v3182_v44 = vpop.f32.mrb[1].mxu0  ;;  %v3184_v29 = vpop.f32.mrb[0].mxu1 }
 0x130   :  { %v3188_v48 = vpop.f32.mrb[1].mxu1  ;;  %v1289_v50 = vrot.slane %v3184_v29, 2  ;;  %v1240_v56 = vrot.slane %v3182_v44, 1 }
 0x132   :  { %v342_v51 = vpop.f32.mrb[2].mxu0 }
 0x133   :  { %v344_v52 = vpop.f32.mrb[3].mxu0  ;;  %v503_v53 = vpop.f32.mrb[2].mxu1 }
 0x134   :  { %v1241_v57 = vrot.slane %v344_v52, 1  ;;  %v1290_v58 = vrot.slane %v503_v53, 2  ;;  %v3195_v60 = vpop.f32.mrb[3].mxu1  ;;  %v2006_v53 = vld [vmem:[#allocation7 + $0xe0] sm:$0xff] }
 0x136   :  { %v1271_v62 = vsel %vm1256_vm1, %v1240_v56, %v1241_v57  ;;  %v1320_v1 = vsel %vm1305_vm2, %v1289_v50, %v1290_v58  ;;  %v348_v2 = vpop.f32.mrb[4].mxu0 }
 0x137   :  { %v1273_v3 = vadd.f32 %v1271_v62, %v336_v28  ;;  %v350_v4 = vpop.f32.mrb[5].mxu0  ;;  %v509_v5 = vpop.f32.mrb[4].mxu1  ;;  %v2709_v62 = vpack.c.bf16 %v2007_v54, %v2006_v53 }
 0x138   :  { %v1242_v8 = vrot.slane %v350_v4, 1  ;;  %v1291_v11 = vrot.slane %v509_v5, 2  ;;  %v3209_v12 = vpop.f32.mrb[5].mxu1 }
 0x139   :  { %v1322_v15 = vadd.f32 %v1320_v1, %v1273_v3  ;;  %2710 = vmatpush3.bf16.msra.mxu0 %v2709_v62 }
 0x13a   :  { %v1270_v16 = vsel %vm1256_vm1, %v1241_v57, %v1242_v8  ;;  %v1319_v46 = vsel %vm1305_vm2, %v1290_v58, %v1291_v11  ;;  %v354_v59 = vpop.f32.mrb[6].mxu0  ;;  %2711 = vmatprep.subr.bf16.mxu0 %v3928_v18 }
 0x13b   :  { %v1274_v17 = vadd.f32 %v1270_v16, %v342_v51  ;;  %v356_v9 = vpop.f32.mrb[7].mxu0  ;;  %v515_v22 = vpop.f32.mrb[6].mxu1 }
 0x13c   :  { %v1243_v20 = vrot.slane %v356_v9, 1  ;;  %v1292_v30 = vrot.slane %v515_v22, 2  ;;  %v3217_v49 = vpop.f32.mrb[7].mxu1 }
 0x13d   :  { %v1323_v32 = vadd.f32 %v1319_v46, %v1274_v17 }
 0x13e   :  { %v1269_v63 = vsel %vm1256_vm1, %v1242_v8, %v1243_v20  ;;  %v1318_v33 = vsel %vm1305_vm2, %v1291_v11, %v1292_v30  ;;  %v360_v34 = vpop.f32.mrb[8].mxu0 }
 0x13f   :  { %v1345_v14 = vsel %vm1339_vm3, %v1323_v32, -inf  ;;  %v1275_v36 = vadd.f32 %v1269_v63, %v348_v2  ;;  %v362_v37 = vpop.f32.mrb[9].mxu0  ;;  %v521_v21 = vpop.f32.mrb[8].mxu1 }
 0x140   :  { %v1360_v23 = vmax.f32 %v1322_v15, %v1345_v14  ;;  %v1244_v40 = vrot.slane %v362_v37, 1  ;;  %v1293_v41 = vrot.slane %v521_v21, 2  ;;  %v3226_v24 = vpop.f32.mrb[9].mxu1  ;;  %v2009_v15 = vld [vmem:[#allocation7 + $0xf8] sm:$0xff] }
 0x141   :  { %v1324_v25 = vadd.f32 %v1318_v33, %v1275_v36  ;;  %v2712_v22 = vpack.c.bf16 %v2009_v15, %v2008_v13 }
 0x142   :  { %v1361_v27 = vrot.slane %v1360_v23, 4  ;;  %v1268_v28 = vsel %vm1256_vm1, %v1243_v20, %v1244_v40  ;;  %v1317_v42 = vsel %vm1305_vm2, %v1292_v30, %v1293_v41  ;;  %v366_v43 = vpop.f32.mrb[10].mxu0 }
 0x143   :  { %v1276_v47 = vadd.f32 %v1268_v28, %v354_v59  ;;  %v368_v51 = vpop.f32.mrb[11].mxu0  ;;  %v527_v52 = vpop.f32.mrb[10].mxu1  ;;  %2713 = vmatpush3.bf16.msra.mxu0 %v2712_v22 }
 0x144   :  { %v1362_v55 = vmax.f32 %v1360_v23, %v1361_v27  ;;  %v1245_v57 = vrot.slane %v368_v51, 1  ;;  %v1294_v58 = vrot.slane %v527_v52, 2  ;;  %v3232_v61 = vpop.f32.mrb[11].mxu1  ;;  %2738 = vmatprep.subr.bf16.mxu0 %v3928_v18 }
 0x145   :  { %v1325_v1 = vadd.f32 %v1317_v42, %v1276_v47 }
 0x146   :  { %v1267_v2 = vsel %vm1256_vm1, %v1244_v40, %v1245_v57  ;;  %v1316_v3 = vsel %vm1305_vm2, %v1293_v41, %v1294_v58  ;;  %v372_v4 = vpop.f32.mrb[12].mxu0  ;;  %v1363_v5 = vrot.slane %v1362_v55, 2 }
 0x147   :  { %v1347_v6 = vsel %vm1339_vm3, %v1325_v1, -inf  ;;  %v1277_v7 = vadd.f32 %v1267_v2, %v360_v34  ;;  %v374_v8 = vpop.f32.mrb[13].mxu0  ;;  %v533_v11 = vpop.f32.mrb[12].mxu1 }
 0x148   :  { %v1367_v16 = vmax.f32 %v1324_v25, %v1347_v6  ;;  %v1246_v46 = vrot.slane %v374_v8, 1  ;;  %v1295_v59 = vrot.slane %v533_v11, 2  ;;  %v3241_v17 = vpop.f32.mrb[13].mxu1  ;;  %v1364_v31 = vmax.f32 %v1362_v55, %v1363_v5  ;;  %v3266_v5 = vld [vmem:[%s3924_s2] ss:$0 sm:$0xff] }
 0x149   :  { %v1326_v9 = vadd.f32 %v1316_v3, %v1277_v7 }
 0x14a   :  { %v1368_v19 = vrot.slane %v1367_v16, 4  ;;  %v1266_v35 = vsel %vm1256_vm1, %v1245_v57, %v1246_v46  ;;  %v1315_v20 = vsel %vm1305_vm2, %v1294_v58, %v1295_v59  ;;  %v378_v30 = vpop.f32.mrb[14].mxu0  ;;  %v1365_v41 = vrot.slane %v1364_v31, 1 }
 0x14b   :  { %v1278_v32 = vadd.f32 %v1266_v35, %v366_v43  ;;  %v380_v63 = vpop.f32.mrb[15].mxu0  ;;  %v539_v33 = vpop.f32.mrb[14].mxu1 }
 0x14c   :  { %v1369_v34 = vmax.f32 %v1367_v16, %v1368_v19  ;;  %v1247_v14 = vrot.slane %v380_v63, 1  ;;  %v1296_v36 = vrot.slane %v539_v33, 2  ;;  %v3248_v37 = vpop.f32.mrb[15].mxu1  ;;  %v1366_v62 = vmax.f32 %v1364_v31, %v1365_v41 }
 0x14d   :  { %v1327_v21 = vadd.f32 %v1315_v20, %v1278_v32 }
 0x14e   :  { %v1370_v38 = vrot.slane %v1369_v34, 2  ;;  %v1265_v39 = vsel %vm1256_vm1, %v1246_v46, %v1247_v14  ;;  %v1314_v23 = vsel %vm1305_vm2, %v1295_v59, %v1296_v36  ;;  %v384_v40 = vpop.f32.mrb[16].mxu0  ;;  %v1422_v19 = vadd.f32 %v3266_v5, %v1366_v62 }
 0x14f   :  { %v1349_v25 = vsel %vm1339_vm3, %v1327_v21, -inf  ;;  %v1279_v26 = vadd.f32 %v1265_v39, %v372_v4  ;;  %v386_v27 = vpop.f32.mrb[17].mxu0  ;;  %v545_v28 = vpop.f32.mrb[16].mxu1 }
 0x150   :  { %v1371_v42 = vmax.f32 %v1369_v34, %v1370_v38  ;;  %v1374_v43 = vmax.f32 %v1326_v9, %v1349_v25  ;;  %v1248_v47 = vrot.slane %v386_v27, 1  ;;  %v3257_v51 = vpop.f32.mrb[17].mxu1  ;;  %v1297_v53 = vrot.slane %v545_v28, 2 }
 0x151   :  { %v1328_v52 = vadd.f32 %v1314_v23, %v1279_v26  ;;  %v1430_v26 = vmax.f32 %v1422_v19, 0.0 }
 0x152   :  { %v1372_v54 = vrot.slane %v1371_v42, 1  ;;  %v1375_v55 = vrot.slane %v1374_v43, 4  ;;  %v1264_v57 = vsel %vm1256_vm1, %v1247_v14, %v1248_v47  ;;  %v390_v58 = vpop.f32.mrb[18].mxu0  ;;  %v1313_v2 = vsel %vm1305_vm2, %v1296_v36, %v1297_v53 }
 0x153   :  { %v1280_v1 = vadd.f32 %v1264_v57, %v378_v30  ;;  %v392_v3 = vpop.f32.mrb[19].mxu0  ;;  %v551_v4 = vpop.f32.mrb[18].mxu1 }
 0x154   :  { %v1373_v6 = vmax.f32 %v1371_v42, %v1372_v54  ;;  %v1376_v7 = vmax.f32 %v1374_v43, %v1375_v55  ;;  %v1249_v8 = vrot.slane %v392_v3, 1  ;;  %v1298_v11 = vrot.slane %v551_v4, 2  ;;  %v3268_v13 = vpop.f32.mrb[19].mxu1 }
 0x155   :  { %v1329_v15 = vadd.f32 %v1313_v2, %v1280_v1 }
 0x156   :  { %v1423_v16 = vadd.f32 %v3266_v5, %v1373_v6  ;;  %v1377_v46 = vrot.slane %v1376_v7, 2  ;;  %v1263_v59 = vsel %vm1256_vm1, %v1248_v47, %v1249_v8  ;;  %v1312_v9 = vsel %vm1305_vm2, %v1297_v53, %v1298_v11  ;;  %v396_v22 = vpop.f32.mrb[20].mxu0 }
 0x157   :  { %v1351_v35 = vsel %vm1339_vm3, %v1329_v15, -inf  ;;  %v1281_v20 = vadd.f32 %v1263_v59, %v384_v40  ;;  %v398_v30 = vpop.f32.mrb[21].mxu0  ;;  %v557_v31 = vpop.f32.mrb[20].mxu1 }
 0x158   :  { %v1431_v32 = vmax.f32 %v1423_v16, 0.0  ;;  %v1378_v63 = vmax.f32 %v1376_v7, %v1377_v46  ;;  %v1381_v33 = vmax.f32 %v1328_v52, %v1351_v35  ;;  %v1250_v34 = vrot.slane %v398_v30, 1  ;;  %v3278_v14 = vpop.f32.mrb[21].mxu1 }
 0x159   :  { %v1330_v36 = vadd.f32 %v1312_v9, %v1281_v20  ;;  %v1299_v21 = vrot.slane %v557_v31, 2 }
 0x15a   :  { %v2118_v38 = vrot.slane %v1431_v32, 7  ;;  %v1379_v39 = vrot.slane %v1378_v63, 1  ;;  %v1382_v23 = vrot.slane %v1381_v33, 4  ;;  %v1262_v41 = vsel %vm1256_vm1, %v1249_v8, %v1250_v34  ;;  %v402_v25 = vpop.f32.mrb[22].mxu0 }
 0x15b   :  { %v1282_v40 = vadd.f32 %v1262_v41, %v390_v58  ;;  %v1311_v27 = vsel %vm1305_vm2, %v1298_v11, %v1299_v21  ;;  %v404_v28 = vpop.f32.mrb[23].mxu0  ;;  %v563_v42 = vpop.f32.mrb[22].mxu1 }
 0x15c   :  { %v1380_v43 = vmax.f32 %v1378_v63, %v1379_v39  ;;  %v1383_v47 = vmax.f32 %v1381_v33, %v1382_v23  ;;  %v1251_v52 = vrot.slane %v404_v28, 1  ;;  %v1300_v53 = vrot.slane %v563_v42, 2  ;;  %v3284_v54 = vpop.f32.mrb[23].mxu1 }
 0x15d   :  { %v1331_v55 = vadd.f32 %v1311_v27, %v1282_v40  ;;  %v2119_v57 = vsel %vm2019_vm4, %v2118_v38, %v1430_v26 }
 0x15e   :  { %v1424_v62 = vadd.f32 %v3266_v5, %v1380_v43  ;;  %v1384_v1 = vrot.slane %v1383_v47, 2  ;;  %v1261_v58 = vsel %vm1256_vm1, %v1250_v34, %v1251_v52  ;;  %v1310_v2 = vsel %vm1305_vm2, %v1299_v21, %v1300_v53  ;;  %v408_v3 = vpop.f32.mrb[24].mxu0 }
 0x15f   :  { %v1353_v4 = vsel %vm1339_vm3, %v1331_v55, -inf  ;;  %v1283_v6 = vadd.f32 %v1261_v58, %v396_v22  ;;  %v410_v7 = vpop.f32.mrb[25].mxu0  ;;  %v569_v8 = vpop.f32.mrb[24].mxu1 }
 0x160   :  { %v1432_v11 = vmax.f32 %v1424_v62, 0.0  ;;  %v1385_v15 = vmax.f32 %v1383_v47, %v1384_v1  ;;  %v1388_v16 = vmax.f32 %v1330_v36, %v1353_v4  ;;  %v1252_v46 = vrot.slane %v410_v7, 1  ;;  %v3294_v59 = vpop.f32.mrb[25].mxu1 }
 0x161   :  { %v1332_v9 = vadd.f32 %v1310_v2, %v1283_v6  ;;  %v1301_v19 = vrot.slane %v569_v8, 2 }
 0x162   :  { %v2120_v35 = vrot.slane %v1432_v11, 6  ;;  %v1386_v20 = vrot.slane %v1385_v15, 1  ;;  %v1389_v30 = vrot.slane %v1388_v16, 4  ;;  %v1260_v31 = vsel %vm1256_vm1, %v1251_v52, %v1252_v46  ;;  %v414_v32 = vpop.f32.mrb[26].mxu0 }
 0x163   :  { %v1284_v63 = vadd.f32 %v1260_v31, %v402_v25  ;;  %v1309_v22 = vsel %vm1305_vm2, %v1300_v53, %v1301_v19  ;;  %v416_v33 = vpop.f32.mrb[27].mxu0  ;;  %v575_v34 = vpop.f32.mrb[26].mxu1 }
 0x164   :  { %v1387_v36 = vmax.f32 %v1385_v15, %v1386_v20  ;;  %v1390_v21 = vmax.f32 %v1388_v16, %v1389_v30  ;;  %v1253_v38 = vrot.slane %v416_v33, 1  ;;  %v1302_v39 = vrot.slane %v575_v34, 2  ;;  %v3300_v23 = vpop.f32.mrb[27].mxu1 }
 0x165   :  { %v1333_v41 = vadd.f32 %v1309_v22, %v1284_v63  ;;  %v2121_v26 = vsel %vm2022_vm5, %v2120_v35, %v2119_v57 }
 0x166   :  { %v1425_v40 = vadd.f32 %v3266_v5, %v1387_v36  ;;  %v1391_v27 = vrot.slane %v1390_v21, 2  ;;  %v1259_v25 = vsel %vm1256_vm1, %v1252_v46, %v1253_v38  ;;  %v1308_v28 = vsel %vm1305_vm2, %v1301_v19, %v1302_v39  ;;  %v420_v42 = vpop.f32.mrb[28].mxu0 }
 0x167   :  { %v1355_v43 = vsel %vm1339_vm3, %v1333_v41, -inf  ;;  %v1285_v47 = vadd.f32 %v1259_v25, %v408_v3  ;;  %v422_v52 = vpop.f32.mrb[29].mxu0  ;;  %v581_v53 = vpop.f32.mrb[28].mxu1 }
 0x168   :  { %v1433_v55 = vmax.f32 %v1425_v40, 0.0  ;;  %v1392_v62 = vmax.f32 %v1390_v21, %v1391_v27  ;;  %v1395_v1 = vmax.f32 %v1332_v9, %v1355_v43  ;;  %v1254_v57 = vrot.slane %v422_v52, 1  ;;  %v3310_v58 = vpop.f32.mrb[29].mxu1 }
 0x169   :  { %v1334_v2 = vadd.f32 %v1308_v28, %v1285_v47  ;;  %v1303_v4 = vrot.slane %v581_v53, 2 }
 0x16a   :  { %v2122_v6 = vrot.slane %v1433_v55, 5  ;;  %v1393_v7 = vrot.slane %v1392_v62, 1  ;;  %v1396_v8 = vrot.slane %v1395_v1, 4  ;;  %v1258_v11 = vsel %vm1256_vm1, %v1253_v38, %v1254_v57  ;;  %v426_v15 = vpop.f32.mrb[30].mxu0 }
 0x16b   :  { %v1286_v16 = vadd.f32 %v1258_v11, %v414_v32  ;;  %v1307_v3 = vsel %vm1305_vm2, %v1302_v39, %v1303_v4  ;;  %v587_v46 = vpop.f32.mrb[30].mxu1  ;;  %v428_v19 = vpop.f32.mrb[31].mxu0 }
 0x16c   :  { %v1394_v9 = vmax.f32 %v1392_v62, %v1393_v7  ;;  %v1397_v35 = vmax.f32 %v1395_v1, %v1396_v8  ;;  %v1304_v20 = vrot.slane %v587_v46, 2  ;;  %v1255_v30 = vrot.slane %v428_v19, 1  ;;  %v3316_v31 = vpop.f32.mrb[31].mxu1 }
 0x16d   :  { %v1335_v63 = vadd.f32 %v1307_v3, %v1286_v16  ;;  %v2123_v22 = vsel %vm2025_vm6, %v2122_v6, %v2121_v26 }
 0x16e   :  { %v1426_v33 = vadd.f32 %v3266_v5, %v1394_v9  ;;  %v1398_v34 = vrot.slane %v1397_v35, 2  ;;  %v1306_v32 = vsel %vm1305_vm2, %v1303_v4, %v1304_v20  ;;  %v1321_v36 = vsel %vm1305_vm2, %v1304_v20, %v1289_v50  ;;  %v3326_v21 = vpop.f32.mrb[32].mxu0 }
 0x16f   :  { %v1357_v38 = vsel %vm1339_vm3, %v1335_v63, -inf  ;;  %v1257_v39 = vsel %vm1256_vm1, %v1254_v57, %v1255_v30  ;;  %v1272_v41 = vsel %vm1256_vm1, %v1255_v30, %v1240_v56  ;;  %v3336_v26 = vpop.f32.mrb[33].mxu0  ;;  %v3338_v40 = vpop.f32.mrb[32].mxu1  ;;  %v3933_v43 = vrot.slane %v3326_v21, 1 }
 0x170   :  { %v1399_v29 = vmax.f32 %v1397_v35, %v1398_v34  ;;  %v1402_v27 = vmax.f32 %v1334_v2, %v1357_v38  ;;  %v1287_v50 = vadd.f32 %v1257_v39, %v420_v42  ;;  %v1288_v25 = vadd.f32 %v1272_v41, %v426_v15  ;;  %v3340_v28 = vpop.f32.mrb[33].mxu1 }
 0x171   :  { %v1434_v47 = vmax.f32 %v1426_v33, 0.0  ;;  %v3931_v62 = vrot.slane %v3336_v26, 2  ;;  %v3932_v1 = vrot.slane %v3338_v40, 3 }
 0x172   :  { %v1400_v44 = vrot.slane %v1399_v29, 1  ;;  %v1403_v52 = vrot.slane %v1402_v27, 4  ;;  %v1336_v53 = vadd.f32 %v1306_v32, %v1287_v50  ;;  %v1337_v56 = vadd.f32 %v1321_v36, %v1288_v25  ;;  %v664_v55 = vpop.f32.mrb[34].mxu0 }
 0x173   :  { %v1440_v57 = vrot.slane %v664_v55, 1  ;;  %v666_v42 = vpop.f32.mrb[35].mxu0  ;;  %v825_v2 = vpop.f32.mrb[34].mxu1  ;;  %v2124_v4 = vrot.slane %v1434_v47, 4 }
 0x174   :  { %v1401_v6 = vmax.f32 %v1399_v29, %v1400_v44  ;;  %v1404_v7 = vmax.f32 %v1402_v27, %v1403_v52  ;;  %v1359_v8 = vsel %vm1339_vm3, %v1337_v56, -inf  ;;  %v1488_v11 = vrot.slane %v666_v42, 2  ;;  %v3348_v15 = vpop.f32.mrb[35].mxu1 }
 0x175   :  { %v1409_v16 = vmax.f32 %v1336_v53, %v1359_v8  ;;  %v1469_v3 = vsel %vm1256_vm1, %v3933_v43, %v1440_v57  ;;  %v1536_v46 = vrot.slane %v825_v2, 3  ;;  %v2125_v19 = vsel %vm2028_vm8, %v2124_v4, %v2123_v22 }
 0x176   :  { %v1405_v9 = vrot.slane %v1404_v7, 2  ;;  %v1471_v35 = vadd.f32 %v1469_v3, %v3188_v48  ;;  %v1517_v20 = vsel %vm1305_vm2, %v3931_v62, %v1488_v11  ;;  %v670_v30 = vpop.f32.mrb[36].mxu0  ;;  %v1427_v63 = vadd.f32 %v3266_v5, %v1401_v6 }
 0x177   :  { %v1410_v33 = vrot.slane %v1409_v16, 4  ;;  %v1566_v34 = vsel %vm1551_vm7, %v3932_v1, %v1536_v46  ;;  %v1441_v32 = vrot.slane %v670_v30, 1  ;;  %v672_v36 = vpop.f32.mrb[37].mxu0  ;;  %v831_v22 = vpop.f32.mrb[36].mxu1 }
 0x178   :  { %v1406_v38 = vmax.f32 %v1404_v7, %v1405_v9  ;;  %v1519_v39 = vadd.f32 %v1517_v20, %v1471_v35  ;;  %v1489_v48 = vrot.slane %v672_v36, 2  ;;  %v1537_v41 = vrot.slane %v831_v22, 3  ;;  %v3365_v29 = vpop.f32.mrb[37].mxu1 }
 0x179   :  { %v1411_v27 = vmax.f32 %v1409_v16, %v1410_v33  ;;  %v1468_v50 = vsel %vm1256_vm1, %v1440_v57, %v1441_v32  ;;  %v1435_v25 = vmax.f32 %v1427_v63, 0.0 }
 0x17a   :  { %v1407_v47 = vrot.slane %v1406_v38, 1  ;;  %v1568_v44 = vadd.f32 %v1566_v34, %v1519_v39  ;;  %v1472_v52 = vadd.f32 %v1468_v50, %v3195_v60  ;;  %v1516_v53 = vsel %vm1305_vm2, %v1488_v11, %v1489_v48  ;;  %v676_v56 = vpop.f32.mrb[38].mxu0 }
 0x17b   :  { %v1412_v55 = vrot.slane %v1411_v27, 2  ;;  %v1565_v42 = vsel %vm1551_vm7, %v1536_v46, %v1537_v41  ;;  %v1442_v2 = vrot.slane %v676_v56, 1  ;;  %v678_v4 = vpop.f32.mrb[39].mxu0  ;;  %v837_v6 = vpop.f32.mrb[38].mxu1  ;;  %v2126_v7 = vrot.slane %v1435_v25, 3 }
 0x17c   :  { %v1408_v8 = vmax.f32 %v1406_v38, %v1407_v47  ;;  %v1520_v57 = vadd.f32 %v1516_v53, %v1472_v52  ;;  %v1490_v16 = vrot.slane %v678_v4, 2  ;;  %v1538_v3 = vrot.slane %v837_v6, 3  ;;  %v3374_v9 = vpop.f32.mrb[39].mxu1 }
 0x17d   :  { %v1413_v35 = vmax.f32 %v1411_v27, %v1412_v55  ;;  %v1467_v60 = vsel %vm1256_vm1, %v1441_v32, %v1442_v2  ;;  %v2127_v11 = vsel %vm2031_vm9, %v2126_v7, %v2125_v19 }
 0x17e   :  { %v1569_v20 = vadd.f32 %v1565_v42, %v1520_v57  ;;  %v1473_v46 = vadd.f32 %v1467_v60, %v3209_v12  ;;  %v1515_v30 = vsel %vm1305_vm2, %v1489_v48, %v1490_v16  ;;  %v1564_v63 = vsel %vm1551_vm7, %v1537_v41, %v1538_v3  ;;  %v682_v33 = vpop.f32.mrb[40].mxu0 }
 0x17f   :  { %v1443_v34 = vrot.slane %v682_v33, 1  ;;  %v684_v36 = vpop.f32.mrb[41].mxu0  ;;  %v843_v22 = vpop.f32.mrb[40].mxu1  ;;  %v1414_v38 = vrot.slane %v1413_v35, 1  ;;  %v1428_v39 = vadd.f32 %v3266_v5, %v1408_v8 }
 0x180   :  { %v1591_v19 = vsel %vm1585_vm10, %v1569_v20, -inf  ;;  %v1521_v32 = vadd.f32 %v1515_v30, %v1473_v46  ;;  %v1491_v27 = vrot.slane %v684_v36, 2  ;;  %v1539_v12 = vrot.slane %v843_v22, 3  ;;  %v3388_v50 = vpop.f32.mrb[41].mxu1 }
 0x181   :  { %v1606_v48 = vmax.f32 %v1568_v44, %v1591_v19  ;;  %v1466_v41 = vsel %vm1256_vm1, %v1442_v2, %v1443_v34  ;;  %v1415_v25 = vmax.f32 %v1413_v35, %v1414_v38  ;;  %v1436_v47 = vmax.f32 %v1428_v39, 0.0 }
 0x182   :  { %v1570_v52 = vadd.f32 %v1564_v63, %v1521_v32  ;;  %v1474_v53 = vadd.f32 %v1466_v41, %v3217_v49  ;;  %v1514_v56 = vsel %vm1305_vm2, %v1490_v16, %v1491_v27  ;;  %v1563_v55 = vsel %vm1551_vm7, %v1538_v3, %v1539_v12  ;;  %v688_v42 = vpop.f32.mrb[42].mxu0 }
 0x183   :  { %v1607_v4 = vrot.slane %v1606_v48, 4  ;;  %v1444_v6 = vrot.slane %v688_v42, 1  ;;  %v690_v7 = vpop.f32.mrb[43].mxu0  ;;  %v849_v8 = vpop.f32.mrb[42].mxu1  ;;  %v1429_v44 = vadd.f32 %v3266_v5, %v1415_v25  ;;  %v2128_v57 = vrot.slane %v1436_v47, 2 }
 0x184   :  { %v1522_v2 = vadd.f32 %v1514_v56, %v1474_v53  ;;  %v1492_v35 = vrot.slane %v690_v7, 2  ;;  %v1540_v60 = vrot.slane %v849_v8, 3  ;;  %v3398_v20 = vpop.f32.mrb[43].mxu1 }
 0x185   :  { %v1608_v49 = vmax.f32 %v1606_v48, %v1607_v4  ;;  %v1465_v16 = vsel %vm1256_vm1, %v1443_v34, %v1444_v6  ;;  %v1437_v46 = vmax.f32 %v1429_v44, 0.0  ;;  %v2129_v3 = vsel %vm2034_vm11, %v2128_v57, %v2127_v11 }
 0x186   :  { %v1571_v30 = vadd.f32 %v1563_v55, %v1522_v2  ;;  %v1475_v63 = vadd.f32 %v1465_v16, %v3226_v24  ;;  %v1513_v5 = vsel %vm1305_vm2, %v1491_v27, %v1492_v35  ;;  %v1562_v33 = vsel %vm1551_vm7, %v1539_v12, %v1540_v60  ;;  %v694_v36 = vpop.f32.mrb[44].mxu0 }
 0x187   :  { %v1609_v22 = vrot.slane %v1608_v49, 2  ;;  %v1445_v38 = vrot.slane %v694_v36, 1  ;;  %v696_v39 = vpop.f32.mrb[45].mxu0  ;;  %v855_v19 = vpop.f32.mrb[44].mxu1  ;;  %v2130_v32 = vrot.slane %v1437_v46, 1 }
 0x188   :  { %v1593_v34 = vsel %vm1585_vm10, %v1571_v30, -inf  ;;  %v1523_v48 = vadd.f32 %v1513_v5, %v1475_v63  ;;  %v1493_v11 = vrot.slane %v696_v39, 2  ;;  %v1541_v41 = vrot.slane %v855_v19, 3  ;;  %v3410_v25 = vpop.f32.mrb[45].mxu1  ;;  %v3429_v5 = vld [vmem:[#allocation7 + $0x100] sm:$0xff] }
 0x189   :  { %v1610_v24 = vmax.f32 %v1608_v49, %v1609_v22  ;;  %v1613_v47 = vmax.f32 %v1570_v52, %v1593_v34  ;;  %v1464_v27 = vsel %vm1256_vm1, %v1444_v6, %v1445_v38  ;;  %v2131_v12 = vsel %vm2037_vm12, %v2130_v32, %v2129_v3 }
 0x18a   :  { %v1572_v53 = vadd.f32 %v1562_v33, %v1523_v48  ;;  %v1476_v56 = vadd.f32 %v1464_v27, %v3232_v61  ;;  %v1512_v55 = vsel %vm1305_vm2, %v1492_v35, %v1493_v11  ;;  %v1561_v42 = vsel %vm1551_vm7, %v1540_v60, %v1541_v41  ;;  %2461 = vmatmul.mubr.f32.vlgmr.msra.gmra.mrb[96].mxu1 %v2131_v12  ;;  %v700_v4 = vpop.f32.mrb[46].mxu0  ;;  %v3431_v33 = vld [vmem:[#allocation7 + $0x108] sm:$0xff] }
 0x18b   :  { %v1611_v7 = vrot.slane %v1610_v24, 1  ;;  %v1614_v8 = vrot.slane %v1613_v47, 4  ;;  %v1446_v44 = vrot.slane %v700_v4, 1  ;;  %v702_v52 = vpop.f32.mrb[47].mxu0  ;;  %v861_v57 = vpop.f32.mrb[46].mxu1 }
 0x18c   :  { %v1524_v2 = vadd.f32 %v1512_v55, %v1476_v56  ;;  %v1494_v6 = vrot.slane %v702_v52, 2  ;;  %v1542_v49 = vrot.slane %v861_v57, 3  ;;  %v3420_v16 = vpop.f32.mrb[47].mxu1  ;;  %v3446_v56 = vld [vmem:[#allocation7 + $0x110] sm:$0xff]  ;;  %v3448_v55 = vld [vmem:[#allocation7 + $0x118] sm:$0xff]  ;;  %v3455_v52 = vld [vmem:[#allocation7 + $0x120] sm:$0xff] }
 0x18d   :  { %v1615_v46 = vmax.f32 %v1613_v47, %v1614_v8  ;;  %v1463_v61 = vsel %vm1256_vm1, %v1445_v38, %v1446_v44  ;;  %v1612_v36 = vmax.f32 %v1610_v24, %v1611_v7 }
 0x18e   :  { %v1573_v35 = vadd.f32 %v1561_v42, %v1524_v2  ;;  %v1477_v3 = vadd.f32 %v1463_v61, %v3241_v17  ;;  %v1511_v60 = vsel %vm1305_vm2, %v1493_v11, %v1494_v6  ;;  %v1560_v30 = vsel %vm1551_vm7, %v1541_v41, %v1542_v49  ;;  %v706_v63 = vpop.f32.mrb[48].mxu0  ;;  %v3436_v17 = vld [vmem:[%s3924_s2 + $0x1] ss:$0 sm:$0xff] }
 0x18f   :  { %v1616_v22 = vrot.slane %v1615_v46, 2  ;;  %v1447_v39 = vrot.slane %v706_v63, 1  ;;  %v708_v19 = vpop.f32.mrb[49].mxu0  ;;  %v867_v32 = vpop.f32.mrb[48].mxu1  ;;  %v1668_v57 = vadd.f32 %v3436_v17, %v1612_v36 }
 0x190   :  { %v1595_v38 = vsel %vm1585_vm10, %v1573_v35, -inf  ;;  %v1525_v34 = vadd.f32 %v1511_v60, %v1477_v3  ;;  %v1495_v48 = vrot.slane %v708_v19, 2  ;;  %v1543_v11 = vrot.slane %v867_v32, 3  ;;  %v3440_v41 = vpop.f32.mrb[49].mxu1 }
 0x191   :  { %v1617_v47 = vmax.f32 %v1615_v46, %v1616_v22  ;;  %v1620_v27 = vmax.f32 %v1572_v53, %v1595_v38  ;;  %v1462_v24 = vsel %vm1256_vm1, %v1446_v44, %v1447_v39  ;;  %v3457_v44 = vld [vmem:[#allocation7 + $0x128] sm:$0xff] }
 0x192   :  { %v1574_v42 = vadd.f32 %v1560_v30, %v1525_v34  ;;  %v1478_v4 = vadd.f32 %v1462_v24, %v3248_v37  ;;  %v1510_v7 = vsel %vm1305_vm2, %v1494_v6, %v1495_v48  ;;  %v1559_v8 = vsel %vm1551_vm7, %v1542_v49, %v1543_v11  ;;  %v712_v53 = vpop.f32.mrb[50].mxu0 }
 0x193   :  { %v1618_v2 = vrot.slane %v1617_v47, 1  ;;  %v1621_v46 = vrot.slane %v1620_v27, 4  ;;  %v1448_v61 = vrot.slane %v712_v53, 1  ;;  %v714_v35 = vpop.f32.mrb[51].mxu0  ;;  %v873_v3 = vpop.f32.mrb[50].mxu1 }
 0x194   :  { %v1526_v60 = vadd.f32 %v1510_v7, %v1478_v4  ;;  %v1496_v37 = vrot.slane %v714_v35, 2  ;;  %v1544_v30 = vrot.slane %v873_v3, 3  ;;  %v3460_v63 = vpop.f32.mrb[51].mxu1  ;;  %v1676_v7 = vmax.f32 %v1668_v57, 0.0  ;;  %v3480_v57 = vld [vmem:[#allocation7 + $0x130] sm:$0xff] }
 0x195   :  { %v1619_v49 = vmax.f32 %v1617_v47, %v1618_v2  ;;  %v1622_v22 = vmax.f32 %v1620_v27, %v1621_v46  ;;  %v1461_v19 = vsel %vm1256_vm1, %v1447_v39, %v1448_v61 }
 0x196   :  { %v1575_v32 = vadd.f32 %v1559_v8, %v1526_v60  ;;  %v1479_v38 = vadd.f32 %v1461_v19, %v3257_v51  ;;  %v1509_v34 = vsel %vm1305_vm2, %v1495_v48, %v1496_v37  ;;  %v1558_v24 = vsel %vm1551_vm7, %v1543_v11, %v1544_v30  ;;  %v718_v4 = vpop.f32.mrb[52].mxu0 }
 0x197   :  { %v1669_v47 = vadd.f32 %v3436_v17, %v1619_v49  ;;  %v1623_v27 = vrot.slane %v1622_v22, 2  ;;  %v1449_v53 = vrot.slane %v718_v4, 1  ;;  %v720_v2 = vpop.f32.mrb[53].mxu0  ;;  %v879_v39 = vpop.f32.mrb[52].mxu1  ;;  %v3482_v49 = vld [vmem:[#allocation7 + $0x138] sm:$0xff] }
 0x198   :  { %v1597_v46 = vsel %vm1585_vm10, %v1575_v32, -inf  ;;  %v1527_v8 = vadd.f32 %v1509_v34, %v1479_v38  ;;  %v1497_v35 = vrot.slane %v720_v2, 2  ;;  %v1545_v51 = vrot.slane %v879_v39, 3  ;;  %v3476_v3 = vpop.f32.mrb[53].mxu1 }
 0x199   :  { %v1677_v48 = vmax.f32 %v1669_v47, 0.0  ;;  %v1624_v60 = vmax.f32 %v1622_v22, %v1623_v27  ;;  %v1627_v19 = vmax.f32 %v1574_v42, %v1597_v46  ;;  %v1460_v11 = vsel %vm1256_vm1, %v1448_v61, %v1449_v53 }
 0x19a   :  { %v1576_v4 = vadd.f32 %v1558_v24, %v1527_v8  ;;  %v1480_v36 = vadd.f32 %v1460_v11, %v3268_v13  ;;  %v1508_v32 = vsel %vm1305_vm2, %v1496_v37, %v1497_v35  ;;  %v1557_v38 = vsel %vm1551_vm7, %v1544_v30, %v1545_v51  ;;  %v724_v34 = vpop.f32.mrb[54].mxu0  ;;  %v3493_v24 = vld [vmem:[#allocation7 + $0x140] sm:$0xff]  ;;  %v3495_v37 = vld [vmem:[#allocation7 + $0x148] sm:$0xff] }
 0x19b   :  { %v2018_v47 = vrot.slane %v1677_v48, 7  ;;  %v1625_v22 = vrot.slane %v1624_v60, 1  ;;  %v1628_v42 = vrot.slane %v1627_v19, 4  ;;  %v1450_v27 = vrot.slane %v724_v34, 1  ;;  %v726_v2 = vpop.f32.mrb[55].mxu0  ;;  %v885_v61 = vpop.f32.mrb[54].mxu1 }
 0x19c   :  { %v1528_v39 = vadd.f32 %v1508_v32, %v1480_v36  ;;  %v1498_v46 = vrot.slane %v726_v2, 2  ;;  %v1546_v6 = vrot.slane %v885_v61, 3  ;;  %v3489_v18 = vpop.f32.mrb[55].mxu1 }
 0x19d   :  { %v1626_v30 = vmax.f32 %v1624_v60, %v1625_v22  ;;  %v1629_v8 = vmax.f32 %v1627_v19, %v1628_v42  ;;  %v1459_v48 = vsel %vm1256_vm1, %v1449_v53, %v1450_v27  ;;  %v2020_v11 = vsel %vm2019_vm4, %v2018_v47, %v1676_v7 }
 0x19e   :  { %v1577_v34 = vadd.f32 %v1557_v38, %v1528_v39  ;;  %v1481_v36 = vadd.f32 %v1459_v48, %v3278_v14  ;;  %v1507_v32 = vsel %vm1305_vm2, %v1497_v35, %v1498_v46  ;;  %v1556_v2 = vsel %vm1551_vm7, %v1545_v51, %v1546_v6  ;;  %v730_v61 = vpop.f32.mrb[56].mxu0  ;;  %v3514_v48 = vld [vmem:[#allocation7 + $0x150] sm:$0xff] }
 0x19f   :  { %v1670_v13 = vadd.f32 %v3436_v17, %v1626_v30  ;;  %v1630_v0 = vrot.slane %v1629_v8, 2  ;;  %v1451_v60 = vrot.slane %v730_v61, 1  ;;  %v732_v19 = vpop.f32.mrb[57].mxu0  ;;  %v891_v22 = vpop.f32.mrb[56].mxu1  ;;  %v3516_v61 = vld [vmem:[#allocation7 + $0x158] sm:$0xff] }
 0x1a0   :  { %v1599_v7 = vsel %vm1585_vm10, %v1577_v34, -inf  ;;  %v1529_v14 = vadd.f32 %v1507_v32, %v1481_v36  ;;  %v1499_v38 = vrot.slane %v732_v19, 2  ;;  %v1547_v47 = vrot.slane %v891_v22, 3  ;;  %v3510_v35 = vpop.f32.mrb[57].mxu1 }
 0x1a1   :  { %v1678_v42 = vmax.f32 %v1670_v13, 0.0  ;;  %v1631_v51 = vmax.f32 %v1629_v8, %v1630_v0  ;;  %v1634_v39 = vmax.f32 %v1576_v4, %v1599_v7  ;;  %v1458_v30 = vsel %vm1256_vm1, %v1450_v27, %v1451_v60 }
 0x1a2   :  { %v1578_v12 = vadd.f32 %v1556_v2, %v1529_v14  ;;  %v1482_v53 = vadd.f32 %v1458_v30, %v3284_v54  ;;  %v1506_v34 = vsel %vm1305_vm2, %v1498_v46, %v1499_v38  ;;  %v1555_v36 = vsel %vm1551_vm7, %v1546_v6, %v1547_v47  ;;  %v736_v32 = vpop.f32.mrb[58].mxu0  ;;  %v3527_v2 = vld [vmem:[#allocation7 + $0x160] sm:$0xff]  ;;  %v3529_v46 = vld [vmem:[#allocation7 + $0x168] sm:$0xff] }
 0x1a3   :  { %v2021_v13 = vrot.slane %v1678_v42, 6  ;;  %v1632_v0 = vrot.slane %v1631_v51, 1  ;;  %v1635_v4 = vrot.slane %v1634_v39, 4  ;;  %v1452_v8 = vrot.slane %v736_v32, 1  ;;  %v738_v19 = vpop.f32.mrb[59].mxu0  ;;  %v897_v27 = vpop.f32.mrb[58].mxu1 }
 0x1a4   :  { %v1530_v22 = vadd.f32 %v1506_v34, %v1482_v53  ;;  %v1500_v7 = vrot.slane %v738_v19, 2  ;;  %v1548_v62 = vrot.slane %v897_v27, 3  ;;  %v3523_v1 = vpop.f32.mrb[59].mxu1  ;;  %3941 = vst [vmem:[#allocation13_spill] sm:$0xff] %v3527_v2 }
 0x1a5   :  { %3940 = vst [vmem:[#allocation12_spill] sm:$0xff] %v3523_v1  ;;  %v1633_v6 = vmax.f32 %v1631_v51, %v1632_v0  ;;  %v1636_v14 = vmax.f32 %v1634_v39, %v1635_v4  ;;  %v1457_v42 = vsel %vm1256_vm1, %v1451_v60, %v1452_v8  ;;  %v3534_v30 = vsel %vm2022_vm5, %v2021_v13, %v2020_v11 }
 0x1a6   :  { %v1579_v53 = vadd.f32 %v1555_v36, %v1530_v22  ;;  %v1483_v34 = vadd.f32 %v1457_v42, %v3294_v59  ;;  %v1505_v32 = vsel %vm1305_vm2, %v1499_v38, %v1500_v7  ;;  %v1554_v19 = vsel %vm1551_vm7, %v1547_v47, %v1548_v62  ;;  %v742_v27 = vpop.f32.mrb[60].mxu0  ;;  %v3548_v22 = vld [vmem:[#allocation7 + $0x170] sm:$0xff]  ;;  %v3550_v47 = vld [vmem:[#allocation7 + $0x178] sm:$0xff] }
 0x1a7   :  { %v1671_v54 = vadd.f32 %v3436_v17, %v1633_v6  ;;  %v1637_v51 = vrot.slane %v1636_v14, 2  ;;  %v1453_v39 = vrot.slane %v742_v27, 1  ;;  %v744_v0 = vpop.f32.mrb[61].mxu0  ;;  %v903_v4 = vpop.f32.mrb[60].mxu1 }
 0x1a8   :  { %v1601_v60 = vsel %vm1585_vm10, %v1579_v53, -inf  ;;  %v1531_v59 = vadd.f32 %v1505_v32, %v1483_v34  ;;  %v1501_v36 = vrot.slane %v744_v0, 2  ;;  %v1549_v13 = vrot.slane %v903_v4, 3  ;;  %v3546_v38 = vpop.f32.mrb[61].mxu1 }
 0x1a9   :  { %3942 = vst [vmem:[#allocation14_spill] sm:$0xff] %v3546_v38  ;;  %v1679_v6 = vmax.f32 %v1671_v54, 0.0  ;;  %v1638_v42 = vmax.f32 %v1636_v14, %v1637_v51  ;;  %v1641_v27 = vmax.f32 %v1578_v12, %v1601_v60  ;;  %v1456_v43 = vsel %vm1256_vm1, %v1452_v8, %v1453_v39 }
 0x1aa   :  { %v1580_v1 = vadd.f32 %v1554_v19, %v1531_v59  ;;  %v1484_v11 = vadd.f32 %v1456_v43, %v3300_v23  ;;  %v1504_v53 = vsel %vm1305_vm2, %v1500_v7, %v1501_v36  ;;  %v1553_v34 = vsel %vm1551_vm7, %v1548_v62, %v1549_v13  ;;  %v748_v32 = vpop.f32.mrb[62].mxu0 }
 0x1ab   :  { %v1639_v0 = vrot.slane %v1638_v42, 1  ;;  %v1642_v4 = vrot.slane %v1641_v27, 4  ;;  %v1454_v38 = vrot.slane %v748_v32, 1  ;;  %v909_v2 = vpop.f32.mrb[62].mxu1  ;;  %v750_v54 = vpop.f32.mrb[63].mxu0  ;;  %v2024_v14 = vrot.slane %v1679_v6, 5 }
 0x1ac   :  { %v1532_v8 = vadd.f32 %v1504_v53, %v1484_v11  ;;  %v1550_v19 = vrot.slane %v909_v2, 3  ;;  %v1502_v51 = vrot.slane %v750_v54, 2  ;;  %v3561_v23 = vpop.f32.mrb[63].mxu1  ;;  %v3944_v60 = vrot.slane %v3326_v21, 1 }
 0x1ad   :  { %3943 = vst [vmem:[#allocation15_spill] sm:$0xff] %v3561_v23  ;;  %v1640_v43 = vmax.f32 %v1638_v42, %v1639_v0  ;;  %v1643_v7 = vmax.f32 %v1641_v27, %v1642_v4  ;;  %v1455_v62 = vsel %vm1256_vm1, %v1453_v39, %v1454_v38  ;;  %v3945_v21 = vrot.slane %v3338_v40, 3 }
 0x1ae   :  { %v1470_v59 = vsel %vm1256_vm1, %v1454_v38, %v3944_v60  ;;  %v1581_v32 = vadd.f32 %v1553_v34, %v1532_v8  ;;  %v1485_v6 = vadd.f32 %v1455_v62, %v3310_v58  ;;  %v1552_v11 = vsel %vm1551_vm7, %v1549_v13, %v1550_v19  ;;  %v3574_v42 = vpop.f32.mrb[64].mxu0 }
 0x1af   :  { %v1486_v2 = vadd.f32 %v1470_v59, %v3316_v31  ;;  %v1672_v27 = vadd.f32 %v3436_v17, %v1640_v43  ;;  %v1644_v39 = vrot.slane %v1643_v7, 2  ;;  %v1567_v38 = vsel %vm1551_vm7, %v1550_v19, %v3945_v21  ;;  %v3583_v34 = vpop.f32.mrb[65].mxu0  ;;  %v3585_v58 = vpop.f32.mrb[64].mxu1 }
 0x1b0   :  { %v1503_v53 = vsel %vm1305_vm2, %v1501_v36, %v1502_v51  ;;  %3946 = vst [vmem:[#allocation16_spill] sm:$0xff] %v3583_v34  ;;  %v1603_v31 = vsel %vm1585_vm10, %v1581_v32, -inf  ;;  %v3947_v13 = vrot.slane %v3336_v26, 2  ;;  %v3594_v54 = vpop.f32.mrb[65].mxu1  ;;  %v3935_v43 = vrot.slane %v3583_v34, 2 }
 0x1b1   :  { %v1533_v4 = vadd.f32 %v1503_v53, %v1485_v6  ;;  %3948 = vst [vmem:[#allocation17_spill] sm:$0xff] %v3594_v54  ;;  %v1645_v8 = vmax.f32 %v1643_v7, %v1644_v39  ;;  %v1648_v19 = vmax.f32 %v1580_v1, %v1603_v31  ;;  %v3937_v60 = vrot.slane %v3585_v58, 3 }
 0x1b2   :  { %v1518_v0 = vsel %vm1305_vm2, %v1502_v51, %v3947_v13  ;;  %v3936_v59 = vrot.slane %v3594_v54, 4  ;;  %v986_v32 = vpop.f32.mrb[66].mxu0  ;;  %v1680_v26 = vmax.f32 %v1672_v27, 0.0  ;;  %v3601_v1 = vsel %vm2025_vm6, %v2024_v14, %v3534_v30 }
 0x1b3   :  { %v1534_v36 = vadd.f32 %v1518_v0, %v1486_v2  ;;  %v1582_v62 = vadd.f32 %v1552_v11, %v1533_v4  ;;  %v1646_v21 = vrot.slane %v1645_v8, 1  ;;  %v1649_v12 = vrot.slane %v1648_v19, 4  ;;  %v1147_v53 = vpop.f32.mrb[66].mxu1  ;;  %v988_v13 = vpop.f32.mrb[67].mxu0 }
 0x1b4   :  { %v1686_v6 = vrot.slane %v986_v32, 1  ;;  %v1782_v40 = vrot.slane %v1147_v53, 3  ;;  %v1734_v23 = vrot.slane %v988_v13, 2  ;;  %v1149_v7 = vpop.f32.mrb[67].mxu1  ;;  %v3603_v2 = vrot.slane %v1680_v26, 4 }
 0x1b5   :  { %v1583_v51 = vadd.f32 %v1567_v38, %v1534_v36  ;;  %v1647_v11 = vmax.f32 %v1645_v8, %v1646_v21  ;;  %v1650_v39 = vmax.f32 %v1648_v19, %v1649_v12  ;;  %v3949_v31 = vrot.slane %v3574_v42, 1 }
 0x1b6   :  { %v1811_v30 = vsel %vm1551_vm7, %v3937_v60, %v1782_v40  ;;  %v1763_v12 = vsel %vm1305_vm2, %v3935_v43, %v1734_v23  ;;  %v992_v14 = vpop.f32.mrb[68].mxu0  ;;  %v1830_v19 = vrot.slane %v1149_v7, 4 }
 0x1b7   :  { %v1605_v27 = vsel %vm1585_vm10, %v1583_v51, -inf  ;;  %v1715_v38 = vsel %vm1256_vm1, %v3949_v31, %v1686_v6  ;;  %v1651_v8 = vrot.slane %v1650_v39, 2  ;;  %v1687_v36 = vrot.slane %v992_v14, 1  ;;  %v1153_v32 = vpop.f32.mrb[68].mxu1  ;;  %v994_v26 = vpop.f32.mrb[69].mxu0 }
 0x1b8   :  { %v1655_v0 = vmax.f32 %v1582_v62, %v1605_v27  ;;  %v1717_v4 = vadd.f32 %v1715_v38, %v3340_v28  ;;  %v3622_v28 = vadd.f32 %v3436_v17, %v1647_v11  ;;  %v1783_v51 = vrot.slane %v1153_v32, 3  ;;  %v1155_v13 = vpop.f32.mrb[69].mxu1 }
 0x1b9   :  { %v1735_v53 = vrot.slane %v994_v26, 2  ;;  %v1652_v27 = vmax.f32 %v1650_v39, %v1651_v8  ;;  %v1860_v31 = vsel %vm1845_vm13, %v3936_v59, %v1830_v19  ;;  %v1714_v7 = vsel %vm1256_vm1, %v1686_v6, %v1687_v36 }
 0x1ba   :  { %v1656_v62 = vrot.slane %v1655_v0, 4  ;;  %v1765_v21 = vadd.f32 %v1763_v12, %v1717_v4  ;;  %v1831_v38 = vrot.slane %v1155_v13, 4  ;;  %v1718_v11 = vadd.f32 %v1714_v7, %v3348_v15  ;;  %v998_v12 = vpop.f32.mrb[70].mxu0 }
 0x1bb   :  { %v1810_v4 = vsel %vm1551_vm7, %v1782_v40, %v1783_v51  ;;  %v1653_v32 = vrot.slane %v1652_v27, 1  ;;  %v1762_v39 = vsel %vm1305_vm2, %v1734_v23, %v1735_v53  ;;  %v1688_v26 = vrot.slane %v998_v12, 1  ;;  %v1159_v59 = vpop.f32.mrb[70].mxu1  ;;  %v1000_v60 = vpop.f32.mrb[71].mxu0 }
 0x1bc   :  { %v1657_v14 = vmax.f32 %v1655_v0, %v1656_v62  ;;  %v1813_v43 = vadd.f32 %v1811_v30, %v1765_v21  ;;  %v1859_v8 = vsel %vm1845_vm13, %v1830_v19, %v1831_v38  ;;  %v1766_v0 = vadd.f32 %v1762_v39, %v1718_v11  ;;  %v1161_v62 = vpop.f32.mrb[71].mxu1 }
 0x1bd   :  { %v1784_v30 = vrot.slane %v1159_v59, 3  ;;  %v1654_v15 = vmax.f32 %v1652_v27, %v1653_v32  ;;  %v1713_v40 = vsel %vm1256_vm1, %v1687_v36, %v1688_v26  ;;  %v1736_v21 = vrot.slane %v1000_v60, 2 }
 0x1be   :  { %v1658_v6 = vrot.slane %v1657_v14, 2  ;;  %v1862_v13 = vadd.f32 %v1860_v31, %v1813_v43  ;;  %v1832_v7 = vrot.slane %v1161_v62, 4  ;;  %v1814_v34 = vadd.f32 %v1810_v4, %v1766_v0  ;;  %v1004_v12 = vpop.f32.mrb[72].mxu0 }
 0x1bf   :  { %v1719_v23 = vadd.f32 %v1713_v40, %v3365_v29  ;;  %v1809_v19 = vsel %vm1551_vm7, %v1783_v51, %v1784_v30  ;;  %v1761_v43 = vsel %vm1305_vm2, %v1735_v53, %v1736_v21  ;;  %v1689_v27 = vrot.slane %v1004_v12, 1  ;;  %v1165_v31 = vpop.f32.mrb[72].mxu1  ;;  %v1006_v11 = vpop.f32.mrb[73].mxu0 }
 0x1c0   :  { %v1659_v54 = vmax.f32 %v1657_v14, %v1658_v6  ;;  %v1858_v59 = vsel %vm1845_vm13, %v1831_v38, %v1832_v7  ;;  %v3647_v60 = vadd.f32 %v3436_v17, %v1654_v15  ;;  %v1863_v36 = vadd.f32 %v1859_v8, %v1814_v34  ;;  %v1167_v32 = vpop.f32.mrb[73].mxu1 }
 0x1c1   :  { %v1767_v14 = vadd.f32 %v1761_v43, %v1719_v23  ;;  %v1785_v4 = vrot.slane %v1165_v31, 3  ;;  %v1737_v29 = vrot.slane %v1006_v11, 2  ;;  %v1712_v51 = vsel %vm1256_vm1, %v1688_v26, %v1689_v27 }
 0x1c2   :  { %v1833_v39 = vrot.slane %v1167_v32, 4  ;;  %v1660_v6 = vrot.slane %v1659_v54, 1  ;;  %v1681_v53 = vmax.f32 %v3622_v28, 0.0  ;;  %v1885_v38 = vsel %vm1879_vm14, %v1863_v36, -inf  ;;  %v1010_v8 = vpop.f32.mrb[74].mxu0 }
 0x1c3   :  { %v1815_v0 = vadd.f32 %v1809_v19, %v1767_v14  ;;  %v1720_v62 = vadd.f32 %v1712_v51, %v3374_v9  ;;  %v1808_v34 = vsel %vm1551_vm7, %v1784_v30, %v1785_v4  ;;  %v1900_v15 = vmax.f32 %v1862_v13, %v1885_v38  ;;  %v1171_v12 = vpop.f32.mrb[74].mxu1  ;;  %v1012_v43 = vpop.f32.mrb[75].mxu0 }
 0x1c4   :  { %v1760_v40 = vsel %vm1305_vm2, %v1736_v21, %v1737_v29  ;;  %v1857_v26 = vsel %vm1845_vm13, %v1832_v7, %v1833_v39  ;;  %v1690_v23 = vrot.slane %v1010_v8, 1  ;;  %v1786_v36 = vrot.slane %v1171_v12, 3  ;;  %v1173_v14 = vpop.f32.mrb[75].mxu1 }
 0x1c5   :  { %v1864_v31 = vadd.f32 %v1858_v59, %v1815_v0  ;;  %v1768_v11 = vadd.f32 %v1760_v40, %v1720_v62  ;;  %v1738_v19 = vrot.slane %v1012_v43, 2  ;;  %v1901_v9 = vrot.slane %v1900_v15, 4 }
 0x1c6   :  { %v1711_v30 = vsel %vm1256_vm1, %v1689_v27, %v1690_v23  ;;  %v1834_v32 = vrot.slane %v1173_v14, 4  ;;  %v1661_v13 = vmax.f32 %v1659_v54, %v1660_v6  ;;  %v1807_v7 = vsel %vm1551_vm7, %v1785_v4, %v1786_v36  ;;  %v1016_v59 = vpop.f32.mrb[76].mxu0 }
 0x1c7   :  { %v1816_v51 = vadd.f32 %v1808_v34, %v1768_v11  ;;  %v1721_v21 = vadd.f32 %v1711_v30, %v3388_v50  ;;  %v1759_v38 = vsel %vm1305_vm2, %v1737_v29, %v1738_v19  ;;  %v1902_v0 = vmax.f32 %v1900_v15, %v1901_v9  ;;  %v1177_v40 = vpop.f32.mrb[76].mxu1  ;;  %v1018_v12 = vpop.f32.mrb[77].mxu0 }
 0x1c8   :  { %v1856_v62 = vsel %vm1845_vm13, %v1833_v39, %v1834_v32  ;;  %v1691_v8 = vrot.slane %v1016_v59, 1  ;;  %v1675_v27 = vadd.f32 %v3436_v17, %v1661_v13  ;;  %v1787_v34 = vrot.slane %v1177_v40, 3  ;;  %v1179_v43 = vpop.f32.mrb[77].mxu1 }
 0x1c9   :  { %v1865_v54 = vadd.f32 %v1857_v26, %v1816_v51  ;;  %v1769_v6 = vadd.f32 %v1759_v38, %v1721_v21  ;;  %v1739_v50 = vrot.slane %v1018_v12, 2  ;;  %v1903_v11 = vrot.slane %v1902_v0, 2 }
 0x1ca   :  { %v1710_v4 = vsel %vm1256_vm1, %v1690_v23, %v1691_v8  ;;  %v1835_v29 = vrot.slane %v1179_v43, 4  ;;  %v1682_v15 = vmax.f32 %v3647_v60, 0.0  ;;  %v1806_v17 = vsel %vm1551_vm7, %v1786_v36, %v1787_v34  ;;  %v1022_v26 = vpop.f32.mrb[78].mxu0 }
 0x1cb   :  { %v1887_v39 = vsel %vm1879_vm14, %v1865_v54, -inf  ;;  %v1817_v14 = vadd.f32 %v1807_v7, %v1769_v6  ;;  %v1722_v9 = vadd.f32 %v1710_v4, %v3398_v20  ;;  %v1904_v30 = vmax.f32 %v1902_v0, %v1903_v11  ;;  %v1183_v21 = vpop.f32.mrb[78].mxu1  ;;  %v1024_v60 = vpop.f32.mrb[79].mxu0 }
 0x1cc   :  { %v1907_v13 = vmax.f32 %v1864_v31, %v1887_v39  ;;  %v1758_v51 = vsel %vm1305_vm2, %v1738_v19, %v1739_v50  ;;  %v1855_v23 = vsel %vm1845_vm13, %v1834_v32, %v1835_v29  ;;  %v1692_v40 = vrot.slane %v1022_v26, 1  ;;  %v3683_v12 = vpop.f32.mrb[79].mxu1  ;;  %v3691_v19 = vld [vmem:[%s3924_s2 + $0x2] ss:$0 sm:$0xff] }
 0x1cd   :  { %v1866_v38 = vadd.f32 %v1856_v62, %v1817_v14  ;;  %v1770_v59 = vadd.f32 %v1758_v51, %v1722_v9  ;;  %v1788_v7 = vrot.slane %v1183_v21, 3  ;;  %v1905_v20 = vrot.slane %v1904_v30, 1 }
 0x1ce   :  { %v1908_v54 = vrot.slane %v1907_v13, 4  ;;  %v1683_v36 = vmax.f32 %v1675_v27, 0.0  ;;  %v2029_v31 = vsel %vm2028_vm8, %v3603_v2, %v3601_v1  ;;  %v1709_v0 = vsel %vm1256_vm1, %v1691_v8, %v1692_v40  ;;  %v1028_v27 = vpop.f32.mrb[80].mxu0 }
 0x1cf   :  { %v1818_v32 = vadd.f32 %v1806_v17, %v1770_v59  ;;  %v1805_v62 = vsel %vm1551_vm7, %v1787_v34, %v1788_v7  ;;  %v2030_v6 = vrot.slane %v1681_v53, 3  ;;  %v1906_v43 = vmax.f32 %v1904_v30, %v1905_v20  ;;  %v1189_v4 = vpop.f32.mrb[80].mxu1  ;;  %v1030_v39 = vpop.f32.mrb[81].mxu0 }
 0x1d0   :  { %v1909_v11 = vmax.f32 %v1907_v13, %v1908_v54  ;;  %v1723_v1 = vadd.f32 %v1709_v0, %v3410_v25  ;;  %v2033_v2 = vrot.slane %v1682_v15, 2  ;;  %v2036_v17 = vrot.slane %v1683_v36, 1  ;;  %v3701_v8 = vpop.f32.mrb[81].mxu1 }
 0x1d1   :  { %v1867_v14 = vadd.f32 %v1855_v23, %v1818_v32  ;;  %v2032_v9 = vsel %vm2031_vm9, %v2030_v6, %v2029_v31  ;;  %v1740_v26 = vrot.slane %v1024_v60, 2  ;;  %v3704_v34 = vadd.f32 %v3691_v19, %v1906_v43 }
 0x1d2   :  { %v1910_v28 = vrot.slane %v1909_v11, 2  ;;  %v2035_v53 = vsel %vm2034_vm11, %v2033_v2, %v2032_v9  ;;  %v1836_v30 = vrot.slane %v3683_v12, 4  ;;  %v1693_v51 = vrot.slane %v1028_v27, 1  ;;  %v1034_v23 = vpop.f32.mrb[82].mxu0 }
 0x1d3   :  { %v1889_v25 = vsel %vm1879_vm14, %v1867_v14, -inf  ;;  %v2038_v15 = vsel %vm2037_vm12, %v2036_v17, %v2035_v53  ;;  %v1757_v13 = vsel %vm1305_vm2, %v1739_v50, %v1740_v26  ;;  %v1970_v21 = vmax.f32 %v3704_v34, 0.0  ;;  %v1195_v54 = vpop.f32.mrb[82].mxu1  ;;  %v1036_v36 = vpop.f32.mrb[83].mxu0 }
 0x1d4   :  { %v1911_v60 = vmax.f32 %v1909_v11, %v1910_v28  ;;  %v1914_v59 = vmax.f32 %v1866_v38, %v1889_v25  ;;  %2426 = vmatmul.mubr.f32.vlgmr.msra.gmra.mrb[96].mxu0 %v2038_v15  ;;  %v1771_v20 = vadd.f32 %v1757_v13, %v1723_v1  ;;  %v1854_v12 = vsel %vm1845_vm13, %v1835_v29, %v1836_v30  ;;  %v3718_v6 = vpop.f32.mrb[83].mxu1 }
 0x1d5   :  { %v1708_v31 = vsel %vm1256_vm1, %v1692_v40, %v1693_v51  ;;  %v1789_v32 = vrot.slane %v1189_v4, 3  ;;  %v1741_v0 = vrot.slane %v1030_v39, 2  ;;  %v3950_v50 = vpack.c.bf16 %v3431_v33, %v3429_v5 }
 0x1d6   :  { %v3951_v27 = vmov 0.0   ;;  %v1912_v38 = vrot.slane %v1911_v60, 1  ;;  %v1915_v43 = vrot.slane %v1914_v59, 4  ;;  %v1819_v11 = vadd.f32 %v1805_v62, %v1771_v20  ;;  %v1040_v33 = vpop.f32.mrb[84].mxu0 }
 0x1d7   :  { %2740 = vmatpush3.bf16.msra.mxu0 %v3950_v50  ;;  %2495 = vmatprep.mubr.msk.f32.mxu0 %vm2876_vm0, %v3951_v27  ;;  %v1724_v1 = vadd.f32 %v1708_v31, %v3420_v16  ;;  %v3952_v29 = vmov 0.0|0.0   ;;  %v1804_v40 = vsel %vm1551_vm7, %v1788_v7, %v1789_v32  ;;  %v1756_v2 = vsel %vm1305_vm2, %v1740_v26, %v1741_v0  ;;  %v1201_v28 = vpop.f32.mrb[84].mxu1  ;;  %v3732_v62 = vpop.f32.mrb[85].mxu0 }
 0x1d8   :  { %2741 = vmatprep.subr.bf16.mxu0 %v3952_v29  ;;  %v1837_v4 = vrot.slane %v3701_v8, 4  ;;  %v1694_v5 = vrot.slane %v1034_v23, 1  ;;  %v1913_v39 = vmax.f32 %v1911_v60, %v1912_v38  ;;  %v1916_v14 = vmax.f32 %v1914_v59, %v1915_v43  ;;  %v1203_v26 = vpop.f32.mrb[85].mxu1 }
 0x1d9   :  { %v1868_v9 = vadd.f32 %v1854_v12, %v1819_v11  ;;  %v1772_v17 = vadd.f32 %v1756_v2, %v1724_v1  ;;  %v1790_v53 = vrot.slane %v1195_v54, 3  ;;  %v1742_v25 = vrot.slane %v1036_v36, 2 }
 0x1da   :  { %v1853_v16 = vsel %vm1845_vm13, %v1836_v30, %v1837_v4  ;;  %v1707_v7 = vsel %vm1256_vm1, %v1693_v51, %v1694_v5  ;;  %v3953_v8 = vpack.c.bf16 %v3448_v55, %v3446_v56  ;;  %v1963_v15 = vadd.f32 %v3691_v19, %v1913_v39  ;;  %v1046_v54 = vpop.f32.mrb[86].mxu0 }
 0x1db   :  { %v1917_v13 = vrot.slane %v1916_v14, 2  ;;  %v1820_v23 = vadd.f32 %v1804_v40, %v1772_v17  ;;  %v1725_v60 = vadd.f32 %v1707_v7, %v3440_v41  ;;  %v1803_v30 = vsel %vm1551_vm7, %v1789_v32, %v1790_v53  ;;  %v3749_v31 = vpop.f32.mrb[86].mxu1  ;;  %v3751_v50 = vpop.f32.mrb[87].mxu0 }
 0x1dc   :  { %2743 = vmatpush3.bf16.msra.mxu0 %v3953_v8  ;;  %v1755_v51 = vsel %vm1305_vm2, %v1741_v0, %v1742_v25  ;;  %v1838_v59 = vrot.slane %v3718_v6, 4  ;;  %v1695_v20 = vrot.slane %v1040_v33, 1  ;;  %v1971_v56 = vmax.f32 %v1963_v15, 0.0  ;;  %v1209_v6 = vpop.f32.mrb[87].mxu1 }
 0x1dd   :  { %2744 = vmatprep.subr.bf16.mxu0 %v3952_v29  ;;  %v1918_v55 = vmax.f32 %v1916_v14, %v1917_v13  ;;  %v1869_v36 = vadd.f32 %v1853_v16, %v1820_v23  ;;  %v1773_v12 = vadd.f32 %v1755_v51, %v1725_v60  ;;  %v1791_v27 = vrot.slane %v1201_v28, 3 }
 0x1de   :  { %v1852_v41 = vsel %vm1845_vm13, %v1837_v4, %v1838_v59  ;;  %v1706_v32 = vsel %vm1256_vm1, %v1694_v5, %v1695_v20  ;;  %v1743_v0 = vrot.slane %v3732_v62, 2  ;;  %v3954_v38 = vpack.c.bf16 %v3457_v44, %v3455_v52  ;;  %v3771_v52 = vpop.f32.mrb[88].mxu0 }
 0x1df   :  { %v3761_v43 = vrot.slane %v1971_v56, 7  ;;  %v1919_v11 = vrot.slane %v1918_v55, 1  ;;  %v1891_v1 = vsel %vm1879_vm14, %v1869_v36, -inf  ;;  %v1821_v40 = vadd.f32 %v1803_v30, %v1773_v12  ;;  %v3773_v28 = vpop.f32.mrb[88].mxu1  ;;  %v3775_v62 = vpop.f32.mrb[89].mxu0 }
 0x1e0   :  { %2746 = vmatpush3.bf16.msra.mxu0 %v3954_v38  ;;  %v1921_v2 = vmax.f32 %v1868_v9, %v1891_v1  ;;  %v1726_v4 = vadd.f32 %v1706_v32, %v3460_v63  ;;  %v1802_v5 = vsel %vm1551_vm7, %v1790_v53, %v1791_v27  ;;  %v1754_v33 = vsel %vm1305_vm2, %v1742_v25, %v1743_v0  ;;  %v3779_v53 = vpop.f32.mrb[89].mxu1 }
 0x1e1   :  { %2747 = vmatprep.subr.bf16.mxu0 %v3952_v29  ;;  %v1920_v44 = vmax.f32 %v1918_v55, %v1919_v11  ;;  %v1870_v39 = vadd.f32 %v1852_v41, %v1821_v40  ;;  %v1839_v14 = vrot.slane %v1203_v26, 4  ;;  %v1696_v17 = vrot.slane %v1046_v54, 1 }
 0x1e2   :  { %v1922_v16 = vrot.slane %v1921_v2, 4  ;;  %v1774_v9 = vadd.f32 %v1754_v33, %v1726_v4  ;;  %v1792_v63 = vrot.slane %v3749_v31, 3  ;;  %v1744_v7 = vrot.slane %v3751_v50, 2 }
 0x1e3   :  { %v3955_v25 = vpack.c.bf16 %v3482_v49, %v3480_v57  ;;  %v1964_v8 = vadd.f32 %v3691_v19, %v1920_v44  ;;  %v1851_v26 = vsel %vm1845_vm13, %v1838_v59, %v1839_v14  ;;  %v1705_v15 = vsel %vm1256_vm1, %v1695_v20, %v1696_v17  ;;  %v1058_v57 = vpop.f32.mrb[90].mxu0  ;;  %v3798_v56 = vpop.f32.mrb[90].mxu1 }
 0x1e4   :  { %v1840_v13 = vrot.slane %v1209_v6, 4  ;;  %v1923_v23 = vmax.f32 %v1921_v2, %v1922_v16  ;;  %v1822_v60 = vadd.f32 %v1802_v5, %v1774_v9  ;;  %v1727_v30 = vadd.f32 %v1705_v15, %v3476_v3  ;;  %v3800_v55 = vpop.f32.mrb[91].mxu0  ;;  %v1221_v50 = vpop.f32.mrb[91].mxu1 }
 0x1e5   :  { %2749 = vmatpush3.bf16.msra.mxu0 %v3955_v25  ;;  %v1801_v51 = vsel %vm1551_vm7, %v1791_v27, %v1792_v63  ;;  %v1972_v49 = vmax.f32 %v1964_v8, 0.0  ;;  %v1753_v54 = vsel %vm1305_vm2, %v1743_v0, %v1744_v7  ;;  %v1697_v20 = vrot.slane %v3771_v52, 1 }
 0x1e6   :  { %2750 = vmatprep.subr.bf16.mxu0 %v3952_v29  ;;  %v1850_v59 = vsel %vm1845_vm13, %v1839_v14, %v1840_v13  ;;  %v1924_v36 = vrot.slane %v1923_v23, 2  ;;  %v1871_v12 = vadd.f32 %v1851_v26, %v1822_v60  ;;  %v1775_v3 = vadd.f32 %v1753_v54, %v1727_v30 }
 0x1e7   :  { %v1793_v31 = vrot.slane %v3773_v28, 3  ;;  %v3956_v41 = vpack.c.bf16 %v3495_v37, %v3493_v24  ;;  %v3806_v32 = vrot.slane %v1972_v49, 6  ;;  %v1704_v27 = vsel %vm1256_vm1, %v1696_v17, %v1697_v20  ;;  %v1064_v24 = vpop.f32.mrb[92].mxu0  ;;  %v1225_v33 = vpop.f32.mrb[92].mxu1 }
 0x1e8   :  { %v1745_v0 = vrot.slane %v3775_v62, 2  ;;  %v1841_v6 = vrot.slane %v3779_v53, 4  ;;  %v1925_v38 = vmax.f32 %v1923_v23, %v1924_v36  ;;  %v1893_v11 = vsel %vm1879_vm14, %v1871_v12, -inf  ;;  %v3822_v52 = vpop.f32.mrb[93].mxu0  ;;  %v3824_v62 = vpop.f32.mrb[93].mxu1 }
 0x1e9   :  { %2752 = vmatpush3.bf16.msra.mxu0 %v3956_v41  ;;  %v1823_v1 = vadd.f32 %v1801_v51, %v1775_v3  ;;  %v1728_v40 = vadd.f32 %v1704_v27, %v3489_v18  ;;  %v1928_v37 = vmax.f32 %v1870_v39, %v1893_v11  ;;  %v1800_v2 = vsel %vm1551_vm7, %v1792_v63, %v1793_v31 }
 0x1ea   :  { %2753 = vmatprep.subr.bf16.mxu0 %v3952_v29  ;;  %v1752_v4 = vsel %vm1305_vm2, %v1744_v7, %v1745_v0  ;;  %v1849_v5 = vsel %vm1845_vm13, %v1840_v13, %v1841_v6  ;;  %v1926_v44 = vrot.slane %v1925_v38, 1  ;;  %v1698_v28 = vrot.slane %v1058_v57, 1  ;;  %v1070_v26 = vpop.f32.mrb[94].mxu0 }
 0x1eb   :  { %v1872_v14 = vadd.f32 %v1850_v59, %v1823_v1  ;;  %v1776_v17 = vadd.f32 %v1752_v4, %v1728_v40  ;;  %v3957_v18 = vpack.c.bf16 %v3516_v61, %v3514_v48  ;;  %v1929_v39 = vrot.slane %v1928_v37, 4  ;;  %v1231_v23 = vpop.f32.mrb[94].mxu1  ;;  %v1072_v60 = vpop.f32.mrb[95].mxu0 }
 0x1ec   :  { %v1794_v16 = vrot.slane %v3798_v56, 3  ;;  %v1746_v9 = vrot.slane %v3800_v55, 2  ;;  %v1842_v63 = vrot.slane %v1221_v50, 4  ;;  %v1927_v7 = vmax.f32 %v1925_v38, %v1926_v44  ;;  %v1233_v54 = vpop.f32.mrb[95].mxu1  ;;  %v3960_v55 = vld [vmem:[#allocation12_spill] sm:$0xff]  ;;  %v3964_v44 = vld [vmem:[#allocation15_spill] sm:$0xff] }
 0x1ed   :  { %2755 = vmatpush3.bf16.msra.mxu0 %v3957_v18  ;;  %v1824_v53 = vadd.f32 %v1800_v2, %v1776_v17  ;;  %v1703_v25 = vsel %vm1256_vm1, %v1697_v20, %v1698_v28  ;;  %v1699_v8 = vrot.slane %v1064_v24, 1  ;;  %v1930_v15 = vmax.f32 %v1928_v37, %v1929_v39 }
 0x1ee   :  { %2756 = vmatprep.subr.bf16.mxu0 %v3952_v29  ;;  %v1729_v13 = vadd.f32 %v1703_v25, %v3510_v35  ;;  %v1799_v48 = vsel %vm1551_vm7, %v1793_v31, %v1794_v16  ;;  %v1751_v61 = vsel %vm1305_vm2, %v1745_v0, %v1746_v9  ;;  %v1965_v30 = vadd.f32 %v3691_v19, %v1927_v7  ;;  %v3958_v35 = vld [vmem:[#allocation13_spill] sm:$0xff] }
 0x1ef   :  { %v1873_v51 = vadd.f32 %v1849_v5, %v1824_v53  ;;  %v1848_v57 = vsel %vm1845_vm13, %v1841_v6, %v1842_v63  ;;  %v1702_v49 = vsel %vm1256_vm1, %v1698_v28, %v1699_v8  ;;  %v3959_v59 = vpack.c.bf16 %v3529_v46, %v3958_v35 }
 0x1f0   :  { %v1931_v20 = vrot.slane %v1930_v15, 2  ;;  %v1777_v56 = vadd.f32 %v1751_v61, %v1729_v13  ;;  %v1730_v36 = vadd.f32 %v1702_v49, %v3960_v55  ;;  %v1795_v12 = vrot.slane %v1225_v33, 3  ;;  %v3963_v33 = vld [vmem:[#allocation14_spill] sm:$0xff] }
 0x1f1   :  { %2758 = vmatpush3.bf16.msra.mxu0 %v3959_v59  ;;  %v1895_v3 = vsel %vm1879_vm14, %v1873_v51, -inf  ;;  %v1747_v31 = vrot.slane %v3822_v52, 2  ;;  %v1843_v50 = vrot.slane %v3824_v62, 4  ;;  %v1700_v41 = vrot.slane %v1070_v26, 1 }
 0x1f2   :  { %2759 = vmatprep.subr.bf16.mxu0 %v3952_v29  ;;  %v1932_v27 = vmax.f32 %v1930_v15, %v1931_v20  ;;  %v1935_v0 = vmax.f32 %v1872_v14, %v1895_v3  ;;  %v1825_v6 = vadd.f32 %v1799_v48, %v1777_v56  ;;  %v1798_v46 = vsel %vm1551_vm7, %v1794_v16, %v1795_v12  ;;  %v3968_v48 = vld [vmem:[#allocation17_spill] sm:$0xff] }
 0x1f3   :  { %v1750_v38 = vsel %vm1305_vm2, %v1746_v9, %v1747_v31  ;;  %v1847_v29 = vsel %vm1845_vm13, %v1842_v63, %v1843_v50  ;;  %v1701_v11 = vsel %vm1256_vm1, %v1699_v8, %v1700_v41  ;;  %v3961_v1 = vrot.slane %v3574_v42, 1  ;;  %v3966_v63 = vld [vmem:[#allocation16_spill] sm:$0xff] }
 0x1f4   :  { %v3962_v24 = vpack.c.bf16 %v3550_v47, %v3548_v22  ;;  %v1933_v37 = vrot.slane %v1932_v27, 1  ;;  %v1936_v2 = vrot.slane %v1935_v0, 4  ;;  %v1874_v4 = vadd.f32 %v1848_v57, %v1825_v6 }
 0x1f5   :  { %v1716_v40 = vsel %vm1256_vm1, %v1700_v41, %v3961_v1  ;;  %v1778_v5 = vadd.f32 %v1750_v38, %v1730_v36  ;;  %v1731_v52 = vadd.f32 %v1701_v11, %v3963_v33  ;;  %v1796_v17 = vrot.slane %v1231_v23, 3 }
 0x1f6   :  { %2761 = vmatpush3.bf16.msra.mxu0 %v3962_v24  ;;  %v1732_v14 = vadd.f32 %v1716_v40, %v3964_v44  ;;  %v1748_v28 = vrot.slane %v1072_v60, 2  ;;  %v1934_v62 = vmax.f32 %v1932_v27, %v1933_v37  ;;  %v1937_v18 = vmax.f32 %v1935_v0, %v1936_v2 }
 0x1f7   :  { %v1826_v42 = vadd.f32 %v1798_v46, %v1778_v5  ;;  %v1844_v39 = vrot.slane %v1233_v54, 4  ;;  %v1797_v16 = vsel %vm1551_vm7, %v1795_v12, %v1796_v17  ;;  %v3965_v22 = vrot.slane %v3585_v58, 3 }
 0x1f8   :  { %v1749_v9 = vsel %vm1305_vm2, %v1747_v31, %v1748_v28  ;;  %v3967_v7 = vrot.slane %v3966_v63, 2  ;;  %v1938_v25 = vrot.slane %v1937_v18, 2  ;;  %v3969_v58 = vrot.slane %v3968_v48, 4 }
 0x1f9   :  { %v1812_v47 = vsel %vm1551_vm7, %v1796_v17, %v3965_v22  ;;  %v1875_v8 = vadd.f32 %v1847_v29, %v1826_v42  ;;  %v1779_v26 = vadd.f32 %v1749_v9, %v1731_v52  ;;  %v1846_v13 = vsel %vm1845_vm13, %v1843_v50, %v1844_v39 }
 0x1fa   :  { %v1764_v53 = vsel %vm1305_vm2, %v1748_v28, %v3967_v7  ;;  %v1861_v61 = vsel %vm1845_vm13, %v1844_v39, %v3969_v58  ;;  %v1966_v23 = vadd.f32 %v3691_v19, %v1934_v62  ;;  %v1973_v60 = vmax.f32 %v1965_v30, 0.0 }
 0x1fb   :  { %v1780_v15 = vadd.f32 %v1764_v53, %v1732_v14  ;;  %v1939_v51 = vmax.f32 %v1937_v18, %v1938_v25  ;;  %v1897_v57 = vsel %vm1879_vm14, %v1875_v8, -inf  ;;  %v1827_v49 = vadd.f32 %v1797_v16, %v1779_v26 }
 0x1fc   :  { %v1942_v35 = vmax.f32 %v1874_v4, %v1897_v57  ;;  %v1974_v59 = vmax.f32 %v1966_v23, 0.0  ;;  %v2228_v20 = vsel %vm2019_vm4, %v3761_v43, %v1970_v21  ;;  %v2231_v56 = vrot.slane %v1973_v60, 5 }
 0x1fd   :  { %v1828_v54 = vadd.f32 %v1812_v47, %v1780_v15  ;;  %v1940_v55 = vrot.slane %v1939_v51, 1  ;;  %v1876_v45 = vadd.f32 %v1846_v13, %v1827_v49  ;;  %v2230_v30 = vsel %vm2022_vm5, %v3806_v32, %v2228_v20  ;;  %v2341_v47 = vld [vmem:[%s3926_s4] ss:$0 sm:$0xff] }
 0x1fe   :  { %v1943_v12 = vrot.slane %v1942_v35, 4  ;;  %v2232_v3 = vsel %vm2025_vm6, %v2231_v56, %v2230_v30  ;;  %v2233_v31 = vrot.slane %v1974_v59, 4 }
 0x1ff   :  { %v1877_v36 = vadd.f32 %v1861_v61, %v1828_v54  ;;  %v1941_v50 = vmax.f32 %v1939_v51, %v1940_v55 }
 0x200   :  { %v1944_v27 = vmax.f32 %v1942_v35, %v1943_v12  ;;  %v2234_v0 = vsel %vm2028_vm8, %v2233_v31, %v2232_v3 }
 0x201   :  { %v1899_v41 = vsel %vm1879_vm14, %v1877_v36, -inf  ;;  %v1967_v21 = vadd.f32 %v3691_v19, %v1941_v50 }
 0x202   :  { %v1949_v34 = vmax.f32 %v1876_v45, %v1899_v41  ;;  %v1945_v43 = vrot.slane %v1944_v27, 2 }
 0x203   :  { %v1975_v46 = vmax.f32 %v1967_v21, 0.0 }
 0x204   :  { %v1950_v6 = vrot.slane %v1949_v34, 4  ;;  %v1946_v38 = vmax.f32 %v1944_v27, %v1945_v43 }
 0x205   :  { %v2235_v32 = vrot.slane %v1975_v46, 3 }
 0x206   :  { %v1951_v29 = vmax.f32 %v1949_v34, %v1950_v6  ;;  %v1947_v11 = vrot.slane %v1946_v38, 1 }
 0x207   :  { %v2236_v40 = vsel %vm2031_vm9, %v2235_v32, %v2234_v0 }
 0x208   :  { %v1952_v1 = vrot.slane %v1951_v29, 2  ;;  %v1948_v37 = vmax.f32 %v1946_v38, %v1947_v11 }
 0x20a   :  { %v1953_v24 = vmax.f32 %v1951_v29, %v1952_v1  ;;  %v1968_v2 = vadd.f32 %v3691_v19, %v1948_v37 }
 0x20c   :  { %v1954_v10 = vrot.slane %v1953_v24, 1  ;;  %v1976_v5 = vmax.f32 %v1968_v2, 0.0 }
 0x20e   :  { %v1955_v4 = vmax.f32 %v1953_v24, %v1954_v10  ;;  %v2237_v52 = vrot.slane %v1976_v5, 2 }
 0x210   :  { %v1969_v33 = vadd.f32 %v3691_v19, %v1955_v4  ;;  %v2238_v14 = vsel %vm2034_vm11, %v2237_v52, %v2236_v40 }
 0x212   :  { %v1977_v44 = vmax.f32 %v1969_v33, 0.0 }
 0x214   :  { %v2239_v17 = vrot.slane %v1977_v44, 1 }
 0x216   :  { %v2240_v28 = vsel %vm2037_vm12, %v2239_v17, %v2238_v14 }
 0x217   :  { %2496 = vmatmul.mubr.f32.vlgmr.msra.gmra.mrb[98].mxu0 %v2240_v28 }
 0x25d   :  { %v2199_v62 = vpop.f32.mrb[96].mxu1 }
 0x25e   :  { %v2462_v18 = vpop.f32.mrb[97].mxu1 }
 0x2a7   :  { %v2106_v42 = vpop.f32.mrb[96].mxu0 }
 0x2a8   :  { %v2200_v39 = vadd.f32 %v2199_v62, %v2106_v42  ;;  %v2427_v16 = vpop.f32.mrb[97].mxu0 }
 0x2ea   :  { %v2308_v22 = vpop.f32.mrb[98].mxu0 }
 0x2eb   :  { %v2312_v19 = vadd.f32 %v2308_v22, %v2200_v39  ;;  %v2497_v9 = vpop.f32.mrb[99].mxu0 }
 0x2ed   :  { %v2320_v63 = vadd.f32 %v2341_v47, %v2312_v19 }
 0x2ef   :  { %2321 = vst [vmem:[#allocation8] sm:$0xff] %v2320_v63 }
 0x2f0   :  { %2850 = shalt.err (!%p2847_p0)
}
 0x2f1   :  { %s2851_s1 = scalar_lea.hbm %s3927_s5, 128 }
 0x2f2   :  { %p2852_p1 = scmp.ne.s32.totalorder %s3927_s5, %s2851_s1  ;;  %p2855_p2 = scmp.lt.u32.totalorder %s2851_s1, %s3927_s5 }
 0x2f4   :  { %p2857_p3 = pnand %p2855_p2, %p2852_p1 }
 0x2f6   :  { %2860 = shalt.err (!%p2857_p3)
}
 0x2f7   :  { %2331 = dma.vmem_to_hbm [thread:$0]  %s2329_s13, 128, %s3927_s5, [#allocation4]  }
 0x2f8   :  { %2865 = dma.done.wait [#allocation4], 128  }
 0x2f9   :  { %2866 = vsyncadd [#allocation4], 4294967168 }
 0x2fa   :  { %2335 = vsyncpa [#allocation3], 1 }
 0x2fb   :  { %2336 = vsyncpa [#allocation6], 1 }
 0x2fc   :  { %2337 = vsyncpa [#allocation4], 1 }

</bundles_post_ra>
